<compile_context>
chip_gen: v7x
topology: tpu7x:2x2x1
jax: 0.10.0
libtpu: 0.0.40
codegen_flags: <defaults>
</compile_context>

<pallas_src>
import math

import jax
import jax.numpy as jnp
from jax.experimental import pallas as pl
from jax.experimental.pallas import tpu as pltpu

# ---------------- tiny synthetic BERT config ----------------
VOCAB = 128
MAX_POS = 16
TYPE_VOCAB = 2
HIDDEN = 128
NUM_HEADS = 2
HEAD_DIM = HIDDEN // NUM_HEADS
FFN = 256
NUM_LAYERS = 2
NUM_LABELS = 4            # args.lebel_dim
LOGIT_PAD = 128           # lane-dense classifier output width (sliced outside)
LN_EPS = 1e-12
ATTN_SCALE = 1.0 / math.sqrt(HEAD_DIM)
NEG_INF = -1e9


# ---------------- in-kernel helpers (operate on values, not refs) ----------------
def _mm_w(a, w_bf16):
    """activation (M,K) f32 @ pre-cast bf16 weight (K,N): bf16 MXU, f32 acc."""
    return jax.lax.dot_general(
        a.astype(jnp.bfloat16), w_bf16,
        dimension_numbers=(((1,), (0,)), ((), ())),
        preferred_element_type=jnp.float32)


def _mm_aa(a, b):
    """activation @ activation (both f32 -> bf16 MXU operands, f32 acc)."""
    return jax.lax.dot_general(
        a.astype(jnp.bfloat16), b.astype(jnp.bfloat16),
        dimension_numbers=(((1,), (0,)), ((), ())),
        preferred_element_type=jnp.float32)


def _mm_aa_nt(a, b):
    """a (M,K) @ b (N,K)^T in NT form (no explicit XLU transpose)."""
    return jax.lax.dot_general(
        a.astype(jnp.bfloat16), b.astype(jnp.bfloat16),
        dimension_numbers=(((1,), (1,)), ((), ())),
        preferred_element_type=jnp.float32)


def _layernorm(h, g, b):
    mean = jnp.mean(h, axis=-1, keepdims=True)
    var = jnp.mean(jnp.square(h - mean), axis=-1, keepdims=True)
    return (h - mean) * jax.lax.rsqrt(var + LN_EPS) * g + b


def _gelu(x):
    # TODO(synk): tanh-approximate GELU (HF BERT default is erf-GELU; close).
    return 0.5 * x * (1.0 + jnp.tanh(0.7978845608028654 * (x + 0.044715 * x * x * x)))


# ---------------- the fused whole-model kernel ----------------
def _fused_bert_kernel(emb_ref, bias_ref, cls_sel_ref,
                       emb_ln_g_ref, emb_ln_b_ref,
                       w_qkv_ref, b_qkv_ref, wo_ref, bo_ref,
                       ln1_g_ref, ln1_b_ref,
                       w_ffn1_ref, b_ffn1_ref, w_ffn2_ref, b_ffn2_ref,
                       ln2_g_ref, ln2_b_ref,
                       pooler_w_ref, pooler_b_ref, cls_w_ref, cls_b_ref,
                       logits_ref, ctx_ref):
    # Embedding layernorm (no residual; zeros-residual dropped).
    x = _layernorm(emb_ref[...].astype(jnp.float32),
                   emb_ln_g_ref[...], emb_ln_b_ref[...])          # (B*S, H) f32
    # Precomputed additive attention bias: padding + block-diagonal batch mask.
    bias = bias_ref[...]                                          # (B*S, B*S) f32

    for l in range(NUM_LAYERS):                                   # static unroll
        # --- fused Q|K|V projection: one (H, 3H) matmul (weights already bf16) ---
        qkv = _mm_w(x, w_qkv_ref[l]) + b_qkv_ref[l]               # (B*S, 3H) f32

        # --- attention: per head, one batched score matmul + one context matmul.
        #     Cross-batch keys are killed by the block-diagonal -1e9 bias, so the
        #     whole batch is processed in a single (B*S, B*S) softmax per head. ---
        for h in range(NUM_HEADS):
            c0 = h * HEAD_DIM
            qh = qkv[:, c0:c0 + HEAD_DIM]                         # (B*S, D)
            kh = qkv[:, HIDDEN + c0:HIDDEN + c0 + HEAD_DIM]
            vh = qkv[:, 2 * HIDDEN + c0:2 * HIDDEN + c0 + HEAD_DIM]
            s = _mm_aa_nt(qh, kh) * ATTN_SCALE + bias             # (B*S, B*S) f32
            m = jnp.max(s, axis=-1, keepdims=True)
            p = jnp.exp(s - m)
            p = p * pl.reciprocal(jnp.sum(p, axis=-1, keepdims=True), approx=True)
            # Write head context straight into its 64-lane slot (no concat).
            ctx_ref[:, c0:c0 + HEAD_DIM] = _mm_aa(p, vh)          # (B*S, D)

        # --- attention output projection + add&LN ---
        attn_out = _mm_w(ctx_ref[...], wo_ref[l]) + bo_ref[l]
        x = _layernorm(attn_out + x, ln1_g_ref[l], ln1_b_ref[l])

        # --- FFN + add&LN ---
        h1 = _gelu(_mm_w(x, w_ffn1_ref[l]) + b_ffn1_ref[l])       # (B*S, FFN)
        h2 = _mm_w(h1, w_ffn2_ref[l]) + b_ffn2_ref[l]             # (B*S, H)
        x = _layernorm(h2 + x, ln2_g_ref[l], ln2_b_ref[l])

    # --- pooler (CLS token via one-hot selection matmul, tanh) + classifier ---
    cls_tok = jax.lax.dot_general(
        cls_sel_ref[...], x.astype(jnp.bfloat16),
        dimension_numbers=(((1,), (0,)), ((), ())),
        preferred_element_type=jnp.float32)                       # (B, H) f32
    pooled = jnp.tanh(_mm_w(cls_tok, pooler_w_ref[...]) + pooler_b_ref[...])
    logits = _mm_w(pooled, cls_w_ref[...]) + cls_b_ref[...]       # (B, LOGIT_PAD)
    logits_ref[...] = logits.astype(logits_ref.dtype)


# ---------------- parameter init (deterministic, synthetic) ----------------
def init_params(key):
    def normal(k, shape, scale=0.02):
        return scale * jax.random.normal(k, shape, dtype=jnp.float32)

    keys = iter(jax.random.split(key, 256))
    p = {
        "word_emb": normal(next(keys), (VOCAB, HIDDEN)),
        "pos_emb": normal(next(keys), (MAX_POS, HIDDEN)),
        "type_emb": normal(next(keys), (TYPE_VOCAB, HIDDEN)),
        "emb_ln_g": jnp.ones((HIDDEN,), jnp.float32),
        "emb_ln_b": jnp.zeros((HIDDEN,), jnp.float32),
        "layers": [],
        "pooler_w": normal(next(keys), (HIDDEN, HIDDEN)),
        "pooler_b": jnp.zeros((HIDDEN,), jnp.float32),
        "cls_w": normal(next(keys), (HIDDEN, NUM_LABELS)),
        "cls_b": jnp.zeros((NUM_LABELS,), jnp.float32),
    }
    for _ in range(NUM_LAYERS):
        lp = dict(
            wq=normal(next(keys), (HIDDEN, HIDDEN)), bq=jnp.zeros((HIDDEN,), jnp.float32),
            wk=normal(next(keys), (HIDDEN, HIDDEN)), bk=jnp.zeros((HIDDEN,), jnp.float32),
            wv=normal(next(keys), (HIDDEN, HIDDEN)), bv=jnp.zeros((HIDDEN,), jnp.float32),
            wo=normal(next(keys), (HIDDEN, HIDDEN)), bo=jnp.zeros((HIDDEN,), jnp.float32),
            ln1_g=jnp.ones((HIDDEN,), jnp.float32), ln1_b=jnp.zeros((HIDDEN,), jnp.float32),
            w_ffn1=normal(next(keys), (HIDDEN, FFN)), b_ffn1=jnp.zeros((FFN,), jnp.float32),
            w_ffn2=normal(next(keys), (FFN, HIDDEN)), b_ffn2=jnp.zeros((HIDDEN,), jnp.float32),
            ln2_g=jnp.ones((HIDDEN,), jnp.float32), ln2_b=jnp.zeros((HIDDEN,), jnp.float32),
        )
        p["layers"].append(lp)
    return p


def pack_params(p):
    """Stack per-layer weights, fuse QKV, pre-cast weight matrices to bf16,
    pad the classifier to a lane-dense width.  Biases / LN params stay f32."""
    def stack(getter):
        return jnp.stack([getter(lp) for lp in p["layers"]], axis=0)

    bf = jnp.bfloat16
    cls_w_pad = jnp.zeros((HIDDEN, LOGIT_PAD), jnp.float32).at[:, :NUM_LABELS].set(p["cls_w"])
    cls_b_pad = jnp.zeros((1, LOGIT_PAD), jnp.float32).at[0, :NUM_LABELS].set(p["cls_b"])

    return {
        "word_emb": p["word_emb"],
        "pos_emb": p["pos_emb"],
        "type_emb": p["type_emb"],
        "emb_ln_g": p["emb_ln_g"].reshape(1, HIDDEN),
        "emb_ln_b": p["emb_ln_b"].reshape(1, HIDDEN),
        "w_qkv": stack(lambda lp: jnp.concatenate([lp["wq"], lp["wk"], lp["wv"]], axis=1)).astype(bf),
        "b_qkv": stack(lambda lp: jnp.concatenate([lp["bq"], lp["bk"], lp["bv"]]).reshape(1, 3 * HIDDEN)),
        "wo": stack(lambda lp: lp["wo"]).astype(bf),
        "bo": stack(lambda lp: lp["bo"].reshape(1, HIDDEN)),
        "ln1_g": stack(lambda lp: lp["ln1_g"].reshape(1, HIDDEN)),
        "ln1_b": stack(lambda lp: lp["ln1_b"].reshape(1, HIDDEN)),
        "w_ffn1": stack(lambda lp: lp["w_ffn1"]).astype(bf),
        "b_ffn1": stack(lambda lp: lp["b_ffn1"].reshape(1, FFN)),
        "w_ffn2": stack(lambda lp: lp["w_ffn2"]).astype(bf),
        "b_ffn2": stack(lambda lp: lp["b_ffn2"].reshape(1, HIDDEN)),
        "ln2_g": stack(lambda lp: lp["ln2_g"].reshape(1, HIDDEN)),
        "ln2_b": stack(lambda lp: lp["ln2_b"].reshape(1, HIDDEN)),
        "pooler_w": p["pooler_w"].astype(bf),
        "pooler_b": p["pooler_b"].reshape(1, HIDDEN),
        "cls_w": cls_w_pad.astype(bf),
        "cls_b": cls_b_pad,
    }


# ---------------- model forward (one pallas_call) ----------------
@jax.jit
def bert_forward(packed, input_ids, token_type_ids, attention_mask):
    B, S = input_ids.shape
    positions = jnp.arange(S)[None, :]
    # Embedding gathers stay in plain JAX (dynamic index lookups = glue).
    emb = (jnp.take(packed["word_emb"], input_ids, axis=0)
           + jnp.take(packed["pos_emb"], positions, axis=0)
           + jnp.take(packed["type_emb"], token_type_ids, axis=0))      # (B, S, H)
    emb2 = emb.reshape(B * S, HIDDEN).astype(jnp.float32)

    # Hoisted additive attention bias: padding mask + block-diagonal batch mask,
    # built once in (B*S, B*S) form so the kernel never broadcasts per layer/head.
    pad_flat = ((1.0 - attention_mask.astype(jnp.float32)) * NEG_INF).reshape(B * S)
    batch_id = jnp.arange(B * S) // S
    same_batch = batch_id[:, None] == batch_id[None, :]
    attn_bias = jnp.where(same_batch, pad_flat[None, :], jnp.float32(NEG_INF))  # (B*S, B*S)

    # One-hot CLS-row selector (B, B*S): gathers pooler input via one MXU matmul.
    cls_sel = jax.nn.one_hot(jnp.arange(B) * S, B * S, dtype=jnp.bfloat16)

    vmem = pl.BlockSpec(memory_space=pltpu.MemorySpace.VMEM)
    logits_pad = pl.pallas_call(
        _fused_bert_kernel,
        out_shape=jax.ShapeDtypeStruct((B, LOGIT_PAD), jnp.float32),
        in_specs=[vmem] * 21,
        out_specs=vmem,
        scratch_shapes=[pltpu.VMEM((B * S, HIDDEN), jnp.float32)],
        compiler_params=pltpu.CompilerParams(vmem_limit_bytes=32 * 1024 * 1024),
    )(emb2, attn_bias, cls_sel,
      packed["emb_ln_g"], packed["emb_ln_b"],
      packed["w_qkv"], packed["b_qkv"], packed["wo"], packed["bo"],
      packed["ln1_g"], packed["ln1_b"],
      packed["w_ffn1"], packed["b_ffn1"], packed["w_ffn2"], packed["b_ffn2"],
      packed["ln2_g"], packed["ln2_b"],
      packed["pooler_w"], packed["pooler_b"], packed["cls_w"], packed["cls_b"])
    return logits_pad[:, :NUM_LABELS]


class FineTuning:
    """JAX/Pallas analogue of the PyTorch FineTuning module (eval-mode forward)."""

    def __init__(self, params):
        # TODO(synk): no pretrained-checkpoint load (AutoModel.from_pretrained);
        # weights are deterministic synthetic init instead.
        self.packed = pack_params(params)

    def __call__(self, inputs):
        input_ids, token_type_ids, attention_mask = inputs[:3]
        logits = bert_forward(self.packed, input_ids, token_type_ids, attention_mask)
        return (logits, None, None)


# ---------------- demo ----------------
if __name__ == "__main__":
    B, S = 2, 8
    key = jax.random.PRNGKey(0)
    k_par, k_ids, k_type = jax.random.split(key, 3)

    params = init_params(k_par)
    input_ids = jax.random.randint(k_ids, (B, S), 0, VOCAB, dtype=jnp.int32)
    token_type_ids = jax.random.randint(k_type, (B, S), 0, TYPE_VOCAB, dtype=jnp.int32)
    attention_mask = jnp.ones((B, S), dtype=jnp.int32)
    attention_mask = attention_mask.at[1, -2:].set(0)   # pad last two tokens of batch 1

    model = FineTuning(params)
    logits, _, _ = model((input_ids, token_type_ids, attention_mask))
    logits = jax.block_until_ready(logits)

    assert logits.shape == (B, NUM_LABELS)
    assert bool(jnp.all(jnp.isfinite(logits)))
    print("KERNEL_OK")
</pallas_src>

<mosaic_0001>
module attributes {stable_mosaic.version = 11 : i64} {
  func.func @_fused_bert_kernel(%arg0: memref<16x128xf32, #tpu.memory_space<vmem>>, %arg1: memref<16x16xf32, #tpu.memory_space<vmem>>, %arg2: memref<2x16xbf16, #tpu.memory_space<vmem>>, %arg3: memref<1x128xf32, #tpu.memory_space<vmem>>, %arg4: memref<1x128xf32, #tpu.memory_space<vmem>>, %arg5: memref<2x128x384xbf16, #tpu.memory_space<vmem>>, %arg6: memref<2x1x384xf32, #tpu.memory_space<vmem>>, %arg7: memref<2x128x128xbf16, #tpu.memory_space<vmem>>, %arg8: memref<2x1x128xf32, #tpu.memory_space<vmem>>, %arg9: memref<2x1x128xf32, #tpu.memory_space<vmem>>, %arg10: memref<2x1x128xf32, #tpu.memory_space<vmem>>, %arg11: memref<2x128x256xbf16, #tpu.memory_space<vmem>>, %arg12: memref<2x1x256xf32, #tpu.memory_space<vmem>>, %arg13: memref<2x256x128xbf16, #tpu.memory_space<vmem>>, %arg14: memref<2x1x128xf32, #tpu.memory_space<vmem>>, %arg15: memref<2x1x128xf32, #tpu.memory_space<vmem>>, %arg16: memref<2x1x128xf32, #tpu.memory_space<vmem>>, %arg17: memref<128x128xbf16, #tpu.memory_space<vmem>>, %arg18: memref<1x128xf32, #tpu.memory_space<vmem>>, %arg19: memref<128x128xbf16, #tpu.memory_space<vmem>>, %arg20: memref<1x128xf32, #tpu.memory_space<vmem>>, %arg21: memref<2x128xf32, #tpu.memory_space<vmem>>, %arg22: memref<16x128xf32, #tpu.memory_space<vmem>>) attributes {dimension_semantics = [], scalar_prefetch = 0 : i64, scratch_operands = 1 : i64, tpu.core_type = #tpu.core_type<tc>} {
    %c0 = arith.constant 0 : index
    %c0_0 = arith.constant 0 : index
    %0 = vector.load %arg0[%c0, %c0_0] : memref<16x128xf32, #tpu.memory_space<vmem>>, vector<16x128xf32>
    %c0_1 = arith.constant 0 : index
    %c0_2 = arith.constant 0 : index
    %1 = vector.load %arg3[%c0_1, %c0_2] : memref<1x128xf32, #tpu.memory_space<vmem>>, vector<1x128xf32>
    %c0_3 = arith.constant 0 : index
    %c0_4 = arith.constant 0 : index
    %2 = vector.load %arg4[%c0_3, %c0_4] : memref<1x128xf32, #tpu.memory_space<vmem>>, vector<1x128xf32>
    %cst = arith.constant dense<0.000000e+00> : vector<16xf32>
    %3 = vector.multi_reduction <add>, %0, %cst [1] : vector<16x128xf32> to vector<16xf32>
    %4 = vector.shape_cast %3 : vector<16xf32> to vector<16x1xf32>
    %cst_5 = arith.constant 1.280000e+02 : f32
    %5 = vector.broadcast %cst_5 : f32 to vector<16x1xf32>
    %6 = arith.divf %4, %5 : vector<16x1xf32>
    %7 = vector.broadcast %6 : vector<16x1xf32> to vector<16x128xf32>
    %8 = arith.subf %0, %7 : vector<16x128xf32>
    %9 = arith.mulf %8, %8 : vector<16x128xf32>
    %cst_6 = arith.constant dense<0.000000e+00> : vector<16xf32>
    %10 = vector.multi_reduction <add>, %9, %cst_6 [1] : vector<16x128xf32> to vector<16xf32>
    %11 = vector.shape_cast %10 : vector<16xf32> to vector<16x1xf32>
    %cst_7 = arith.constant 1.280000e+02 : f32
    %12 = vector.broadcast %cst_7 : f32 to vector<16x1xf32>
    %13 = arith.divf %11, %12 : vector<16x1xf32>
    %14 = vector.broadcast %6 : vector<16x1xf32> to vector<16x128xf32>
    %15 = arith.subf %0, %14 : vector<16x128xf32>
    %cst_8 = arith.constant 9.99999996E-13 : f32
    %16 = vector.broadcast %cst_8 : f32 to vector<16x1xf32>
    %17 = arith.addf %13, %16 : vector<16x1xf32>
    %18 = math.rsqrt %17 : vector<16x1xf32>
    %19 = vector.broadcast %18 : vector<16x1xf32> to vector<16x128xf32>
    %20 = arith.mulf %15, %19 : vector<16x128xf32>
    %21 = vector.broadcast %1 : vector<1x128xf32> to vector<16x128xf32>
    %22 = arith.mulf %20, %21 : vector<16x128xf32>
    %23 = vector.broadcast %2 : vector<1x128xf32> to vector<16x128xf32>
    %24 = arith.addf %22, %23 : vector<16x128xf32>
    %c0_9 = arith.constant 0 : index
    %c0_10 = arith.constant 0 : index
    %25 = vector.load %arg1[%c0_9, %c0_10] : memref<16x16xf32, #tpu.memory_space<vmem>>, vector<16x16xf32>
    %c0_11 = arith.constant 0 : index
    %c0_12 = arith.constant 0 : index
    %c0_13 = arith.constant 0 : index
    %26 = vector.load %arg5[%c0_11, %c0_12, %c0_13] : memref<2x128x384xbf16, #tpu.memory_space<vmem>>, vector<1x128x384xbf16>
    %27 = vector.shape_cast %26 : vector<1x128x384xbf16> to vector<128x384xbf16>
    %28 = arith.truncf %24 : vector<16x128xf32> to vector<16x128xbf16>
    %cst_14 = arith.constant dense<0.000000e+00> : vector<16x384xf32>
    %29 = tpu.matmul %28, %27, %cst_14 {dimension_numbers = #tpu.dot_dimension_numbers<[1], [0], [0], [1], [0, 0, 1, 1], [], []>} : vector<16x128xbf16>, vector<128x384xbf16>, vector<16x384xf32> -> vector<16x384xf32>
    %c0_15 = arith.constant 0 : index
    %c0_16 = arith.constant 0 : index
    %c0_17 = arith.constant 0 : index
    %30 = vector.load %arg6[%c0_15, %c0_16, %c0_17] : memref<2x1x384xf32, #tpu.memory_space<vmem>>, vector<1x1x384xf32>
    %31 = vector.shape_cast %30 : vector<1x1x384xf32> to vector<1x384xf32>
    %32 = vector.broadcast %31 : vector<1x384xf32> to vector<16x384xf32>
    %33 = arith.addf %29, %32 : vector<16x384xf32>
    %34 = vector.extract_strided_slice %33 {offsets = [0, 0], sizes = [16, 64], strides = [1, 1]} : vector<16x384xf32> to vector<16x64xf32>
    %35 = vector.extract_strided_slice %33 {offsets = [0, 128], sizes = [16, 64], strides = [1, 1]} : vector<16x384xf32> to vector<16x64xf32>
    %36 = vector.extract_strided_slice %33 {offsets = [0, 256], sizes = [16, 64], strides = [1, 1]} : vector<16x384xf32> to vector<16x64xf32>
    %37 = arith.truncf %34 : vector<16x64xf32> to vector<16x64xbf16>
    %38 = arith.truncf %35 : vector<16x64xf32> to vector<16x64xbf16>
    %cst_18 = arith.constant dense<0.000000e+00> : vector<16x16xf32>
    %39 = tpu.matmul %37, %38, %cst_18 {dimension_numbers = #tpu.dot_dimension_numbers<[1], [1], [0], [0], [0, 0, 1, 0], [], []>} : vector<16x64xbf16>, vector<16x64xbf16>, vector<16x16xf32> -> vector<16x16xf32>
    %cst_19 = arith.constant 1.250000e-01 : f32
    %40 = vector.broadcast %cst_19 : f32 to vector<16x16xf32>
    %41 = arith.mulf %39, %40 : vector<16x16xf32>
    %42 = arith.addf %41, %25 : vector<16x16xf32>
    %cst_20 = arith.constant dense<0xFF800000> : vector<16xf32>
    %43 = vector.multi_reduction <maximumf>, %42, %cst_20 [1] : vector<16x16xf32> to vector<16xf32>
    %44 = vector.shape_cast %43 : vector<16xf32> to vector<16x1xf32>
    %45 = vector.broadcast %44 : vector<16x1xf32> to vector<16x16xf32>
    %46 = arith.subf %42, %45 : vector<16x16xf32>
    %47 = math.exp %46 : vector<16x16xf32>
    %cst_21 = arith.constant dense<0.000000e+00> : vector<16xf32>
    %48 = vector.multi_reduction <add>, %47, %cst_21 [1] : vector<16x16xf32> to vector<16xf32>
    %49 = vector.shape_cast %48 : vector<16xf32> to vector<16x1xf32>
    %50 = tpu.reciprocal %49 {approx = true} : vector<16x1xf32> -> vector<16x1xf32>
    %51 = vector.broadcast %50 : vector<16x1xf32> to vector<16x16xf32>
    %52 = arith.mulf %47, %51 : vector<16x16xf32>
    %53 = arith.truncf %52 : vector<16x16xf32> to vector<16x16xbf16>
    %54 = arith.truncf %36 : vector<16x64xf32> to vector<16x64xbf16>
    %cst_22 = arith.constant dense<0.000000e+00> : vector<16x64xf32>
    %55 = tpu.matmul %53, %54, %cst_22 {dimension_numbers = #tpu.dot_dimension_numbers<[1], [0], [0], [1], [0, 0, 1, 1], [], []>} : vector<16x16xbf16>, vector<16x64xbf16>, vector<16x64xf32> -> vector<16x64xf32>
    %c0_23 = arith.constant 0 : index
    %c0_24 = arith.constant 0 : index
    %56 = vector.load %arg22[%c0_23, %c0_24] : memref<16x128xf32, #tpu.memory_space<vmem>>, vector<16x64xf32>
    tpu.vector_store %arg22[%c0_23, %c0_24], %55 {strides = array<i32>} : memref<16x128xf32, #tpu.memory_space<vmem>>, vector<16x64xf32>,
    %57 = vector.extract_strided_slice %33 {offsets = [0, 64], sizes = [16, 64], strides = [1, 1]} : vector<16x384xf32> to vector<16x64xf32>
    %58 = vector.extract_strided_slice %33 {offsets = [0, 192], sizes = [16, 64], strides = [1, 1]} : vector<16x384xf32> to vector<16x64xf32>
    %59 = vector.extract_strided_slice %33 {offsets = [0, 320], sizes = [16, 64], strides = [1, 1]} : vector<16x384xf32> to vector<16x64xf32>
    %60 = arith.truncf %57 : vector<16x64xf32> to vector<16x64xbf16>
    %61 = arith.truncf %58 : vector<16x64xf32> to vector<16x64xbf16>
    %cst_25 = arith.constant dense<0.000000e+00> : vector<16x16xf32>
    %62 = tpu.matmul %60, %61, %cst_25 {dimension_numbers = #tpu.dot_dimension_numbers<[1], [1], [0], [0], [0, 0, 1, 0], [], []>} : vector<16x64xbf16>, vector<16x64xbf16>, vector<16x16xf32> -> vector<16x16xf32>
    %cst_26 = arith.constant 1.250000e-01 : f32
    %63 = vector.broadcast %cst_26 : f32 to vector<16x16xf32>
    %64 = arith.mulf %62, %63 : vector<16x16xf32>
    %65 = arith.addf %64, %25 : vector<16x16xf32>
    %cst_27 = arith.constant dense<0xFF800000> : vector<16xf32>
    %66 = vector.multi_reduction <maximumf>, %65, %cst_27 [1] : vector<16x16xf32> to vector<16xf32>
    %67 = vector.shape_cast %66 : vector<16xf32> to vector<16x1xf32>
    %68 = vector.broadcast %67 : vector<16x1xf32> to vector<16x16xf32>
    %69 = arith.subf %65, %68 : vector<16x16xf32>
    %70 = math.exp %69 : vector<16x16xf32>
    %cst_28 = arith.constant dense<0.000000e+00> : vector<16xf32>
    %71 = vector.multi_reduction <add>, %70, %cst_28 [1] : vector<16x16xf32> to vector<16xf32>
    %72 = vector.shape_cast %71 : vector<16xf32> to vector<16x1xf32>
    %73 = tpu.reciprocal %72 {approx = true} : vector<16x1xf32> -> vector<16x1xf32>
    %74 = vector.broadcast %73 : vector<16x1xf32> to vector<16x16xf32>
    %75 = arith.mulf %70, %74 : vector<16x16xf32>
    %76 = arith.truncf %75 : vector<16x16xf32> to vector<16x16xbf16>
    %77 = arith.truncf %59 : vector<16x64xf32> to vector<16x64xbf16>
    %cst_29 = arith.constant dense<0.000000e+00> : vector<16x64xf32>
    %78 = tpu.matmul %76, %77, %cst_29 {dimension_numbers = #tpu.dot_dimension_numbers<[1], [0], [0], [1], [0, 0, 1, 1], [], []>} : vector<16x16xbf16>, vector<16x64xbf16>, vector<16x64xf32> -> vector<16x64xf32>
    %c0_30 = arith.constant 0 : index
    %c64 = arith.constant 64 : index
    %79 = vector.load %arg22[%c0_30, %c64] : memref<16x128xf32, #tpu.memory_space<vmem>>, vector<16x64xf32>
    tpu.vector_store %arg22[%c0_30, %c64], %78 {strides = array<i32>} : memref<16x128xf32, #tpu.memory_space<vmem>>, vector<16x64xf32>,
    %c0_31 = arith.constant 0 : index
    %c0_32 = arith.constant 0 : index
    %80 = vector.load %arg22[%c0_31, %c0_32] : memref<16x128xf32, #tpu.memory_space<vmem>>, vector<16x128xf32>
    %c0_33 = arith.constant 0 : index
    %c0_34 = arith.constant 0 : index
    %c0_35 = arith.constant 0 : index
    %81 = vector.load %arg7[%c0_33, %c0_34, %c0_35] : memref<2x128x128xbf16, #tpu.memory_space<vmem>>, vector<1x128x128xbf16>
    %82 = vector.shape_cast %81 : vector<1x128x128xbf16> to vector<128x128xbf16>
    %83 = arith.truncf %80 : vector<16x128xf32> to vector<16x128xbf16>
    %cst_36 = arith.constant dense<0.000000e+00> : vector<16x128xf32>
    %84 = tpu.matmul %83, %82, %cst_36 {dimension_numbers = #tpu.dot_dimension_numbers<[1], [0], [0], [1], [0, 0, 1, 1], [], []>} : vector<16x128xbf16>, vector<128x128xbf16>, vector<16x128xf32> -> vector<16x128xf32>
    %c0_37 = arith.constant 0 : index
    %c0_38 = arith.constant 0 : index
    %c0_39 = arith.constant 0 : index
    %85 = vector.load %arg8[%c0_37, %c0_38, %c0_39] : memref<2x1x128xf32, #tpu.memory_space<vmem>>, vector<1x1x128xf32>
    %86 = vector.shape_cast %85 : vector<1x1x128xf32> to vector<1x128xf32>
    %87 = vector.broadcast %86 : vector<1x128xf32> to vector<16x128xf32>
    %88 = arith.addf %84, %87 : vector<16x128xf32>
    %89 = arith.addf %88, %24 : vector<16x128xf32>
    %c0_40 = arith.constant 0 : index
    %c0_41 = arith.constant 0 : index
    %c0_42 = arith.constant 0 : index
    %90 = vector.load %arg9[%c0_40, %c0_41, %c0_42] : memref<2x1x128xf32, #tpu.memory_space<vmem>>, vector<1x1x128xf32>
    %91 = vector.shape_cast %90 : vector<1x1x128xf32> to vector<1x128xf32>
    %c0_43 = arith.constant 0 : index
    %c0_44 = arith.constant 0 : index
    %c0_45 = arith.constant 0 : index
    %92 = vector.load %arg10[%c0_43, %c0_44, %c0_45] : memref<2x1x128xf32, #tpu.memory_space<vmem>>, vector<1x1x128xf32>
    %93 = vector.shape_cast %92 : vector<1x1x128xf32> to vector<1x128xf32>
    %cst_46 = arith.constant dense<0.000000e+00> : vector<16xf32>
    %94 = vector.multi_reduction <add>, %89, %cst_46 [1] : vector<16x128xf32> to vector<16xf32>
    %95 = vector.shape_cast %94 : vector<16xf32> to vector<16x1xf32>
    %cst_47 = arith.constant 1.280000e+02 : f32
    %96 = vector.broadcast %cst_47 : f32 to vector<16x1xf32>
    %97 = arith.divf %95, %96 : vector<16x1xf32>
    %98 = vector.broadcast %97 : vector<16x1xf32> to vector<16x128xf32>
    %99 = arith.subf %89, %98 : vector<16x128xf32>
    %100 = arith.mulf %99, %99 : vector<16x128xf32>
    %cst_48 = arith.constant dense<0.000000e+00> : vector<16xf32>
    %101 = vector.multi_reduction <add>, %100, %cst_48 [1] : vector<16x128xf32> to vector<16xf32>
    %102 = vector.shape_cast %101 : vector<16xf32> to vector<16x1xf32>
    %cst_49 = arith.constant 1.280000e+02 : f32
    %103 = vector.broadcast %cst_49 : f32 to vector<16x1xf32>
    %104 = arith.divf %102, %103 : vector<16x1xf32>
    %105 = vector.broadcast %97 : vector<16x1xf32> to vector<16x128xf32>
    %106 = arith.subf %89, %105 : vector<16x128xf32>
    %cst_50 = arith.constant 9.99999996E-13 : f32
    %107 = vector.broadcast %cst_50 : f32 to vector<16x1xf32>
    %108 = arith.addf %104, %107 : vector<16x1xf32>
    %109 = math.rsqrt %108 : vector<16x1xf32>
    %110 = vector.broadcast %109 : vector<16x1xf32> to vector<16x128xf32>
    %111 = arith.mulf %106, %110 : vector<16x128xf32>
    %112 = vector.broadcast %91 : vector<1x128xf32> to vector<16x128xf32>
    %113 = arith.mulf %111, %112 : vector<16x128xf32>
    %114 = vector.broadcast %93 : vector<1x128xf32> to vector<16x128xf32>
    %115 = arith.addf %113, %114 : vector<16x128xf32>
    %c0_51 = arith.constant 0 : index
    %c0_52 = arith.constant 0 : index
    %c0_53 = arith.constant 0 : index
    %116 = vector.load %arg11[%c0_51, %c0_52, %c0_53] : memref<2x128x256xbf16, #tpu.memory_space<vmem>>, vector<1x128x256xbf16>
    %117 = vector.shape_cast %116 : vector<1x128x256xbf16> to vector<128x256xbf16>
    %118 = arith.truncf %115 : vector<16x128xf32> to vector<16x128xbf16>
    %cst_54 = arith.constant dense<0.000000e+00> : vector<16x256xf32>
    %119 = tpu.matmul %118, %117, %cst_54 {dimension_numbers = #tpu.dot_dimension_numbers<[1], [0], [0], [1], [0, 0, 1, 1], [], []>} : vector<16x128xbf16>, vector<128x256xbf16>, vector<16x256xf32> -> vector<16x256xf32>
    %c0_55 = arith.constant 0 : index
    %c0_56 = arith.constant 0 : index
    %c0_57 = arith.constant 0 : index
    %120 = vector.load %arg12[%c0_55, %c0_56, %c0_57] : memref<2x1x256xf32, #tpu.memory_space<vmem>>, vector<1x1x256xf32>
    %121 = vector.shape_cast %120 : vector<1x1x256xf32> to vector<1x256xf32>
    %122 = vector.broadcast %121 : vector<1x256xf32> to vector<16x256xf32>
    %123 = arith.addf %119, %122 : vector<16x256xf32>
    %cst_58 = arith.constant 5.000000e-01 : f32
    %124 = vector.broadcast %cst_58 : f32 to vector<16x256xf32>
    %125 = arith.mulf %124, %123 : vector<16x256xf32>
    %cst_59 = arith.constant 4.471500e-02 : f32
    %126 = vector.broadcast %cst_59 : f32 to vector<16x256xf32>
    %127 = arith.mulf %126, %123 : vector<16x256xf32>
    %128 = arith.mulf %127, %123 : vector<16x256xf32>
    %129 = arith.mulf %128, %123 : vector<16x256xf32>
    %130 = arith.addf %123, %129 : vector<16x256xf32>
    %cst_60 = arith.constant 0.797884583 : f32
    %131 = vector.broadcast %cst_60 : f32 to vector<16x256xf32>
    %132 = arith.mulf %131, %130 : vector<16x256xf32>
    %133 = math.tanh %132 : vector<16x256xf32>
    %cst_61 = arith.constant 1.000000e+00 : f32
    %134 = vector.broadcast %cst_61 : f32 to vector<16x256xf32>
    %135 = arith.addf %134, %133 : vector<16x256xf32>
    %136 = arith.mulf %125, %135 : vector<16x256xf32>
    %c0_62 = arith.constant 0 : index
    %c0_63 = arith.constant 0 : index
    %c0_64 = arith.constant 0 : index
    %137 = vector.load %arg13[%c0_62, %c0_63, %c0_64] : memref<2x256x128xbf16, #tpu.memory_space<vmem>>, vector<1x256x128xbf16>
    %138 = vector.shape_cast %137 : vector<1x256x128xbf16> to vector<256x128xbf16>
    %139 = arith.truncf %136 : vector<16x256xf32> to vector<16x256xbf16>
    %cst_65 = arith.constant dense<0.000000e+00> : vector<16x128xf32>
    %140 = tpu.matmul %139, %138, %cst_65 {dimension_numbers = #tpu.dot_dimension_numbers<[1], [0], [0], [1], [0, 0, 1, 1], [], []>} : vector<16x256xbf16>, vector<256x128xbf16>, vector<16x128xf32> -> vector<16x128xf32>
    %c0_66 = arith.constant 0 : index
    %c0_67 = arith.constant 0 : index
    %c0_68 = arith.constant 0 : index
    %141 = vector.load %arg14[%c0_66, %c0_67, %c0_68] : memref<2x1x128xf32, #tpu.memory_space<vmem>>, vector<1x1x128xf32>
    %142 = vector.shape_cast %141 : vector<1x1x128xf32> to vector<1x128xf32>
    %143 = vector.broadcast %142 : vector<1x128xf32> to vector<16x128xf32>
    %144 = arith.addf %140, %143 : vector<16x128xf32>
    %145 = arith.addf %144, %115 : vector<16x128xf32>
    %c0_69 = arith.constant 0 : index
    %c0_70 = arith.constant 0 : index
    %c0_71 = arith.constant 0 : index
    %146 = vector.load %arg15[%c0_69, %c0_70, %c0_71] : memref<2x1x128xf32, #tpu.memory_space<vmem>>, vector<1x1x128xf32>
    %147 = vector.shape_cast %146 : vector<1x1x128xf32> to vector<1x128xf32>
    %c0_72 = arith.constant 0 : index
    %c0_73 = arith.constant 0 : index
    %c0_74 = arith.constant 0 : index
    %148 = vector.load %arg16[%c0_72, %c0_73, %c0_74] : memref<2x1x128xf32, #tpu.memory_space<vmem>>, vector<1x1x128xf32>
    %149 = vector.shape_cast %148 : vector<1x1x128xf32> to vector<1x128xf32>
    %cst_75 = arith.constant dense<0.000000e+00> : vector<16xf32>
    %150 = vector.multi_reduction <add>, %145, %cst_75 [1] : vector<16x128xf32> to vector<16xf32>
    %151 = vector.shape_cast %150 : vector<16xf32> to vector<16x1xf32>
    %cst_76 = arith.constant 1.280000e+02 : f32
    %152 = vector.broadcast %cst_76 : f32 to vector<16x1xf32>
    %153 = arith.divf %151, %152 : vector<16x1xf32>
    %154 = vector.broadcast %153 : vector<16x1xf32> to vector<16x128xf32>
    %155 = arith.subf %145, %154 : vector<16x128xf32>
    %156 = arith.mulf %155, %155 : vector<16x128xf32>
    %cst_77 = arith.constant dense<0.000000e+00> : vector<16xf32>
    %157 = vector.multi_reduction <add>, %156, %cst_77 [1] : vector<16x128xf32> to vector<16xf32>
    %158 = vector.shape_cast %157 : vector<16xf32> to vector<16x1xf32>
    %cst_78 = arith.constant 1.280000e+02 : f32
    %159 = vector.broadcast %cst_78 : f32 to vector<16x1xf32>
    %160 = arith.divf %158, %159 : vector<16x1xf32>
    %161 = vector.broadcast %153 : vector<16x1xf32> to vector<16x128xf32>
    %162 = arith.subf %145, %161 : vector<16x128xf32>
    %cst_79 = arith.constant 9.99999996E-13 : f32
    %163 = vector.broadcast %cst_79 : f32 to vector<16x1xf32>
    %164 = arith.addf %160, %163 : vector<16x1xf32>
    %165 = math.rsqrt %164 : vector<16x1xf32>
    %166 = vector.broadcast %165 : vector<16x1xf32> to vector<16x128xf32>
    %167 = arith.mulf %162, %166 : vector<16x128xf32>
    %168 = vector.broadcast %147 : vector<1x128xf32> to vector<16x128xf32>
    %169 = arith.mulf %167, %168 : vector<16x128xf32>
    %170 = vector.broadcast %149 : vector<1x128xf32> to vector<16x128xf32>
    %171 = arith.addf %169, %170 : vector<16x128xf32>
    %c1 = arith.constant 1 : index
    %c0_80 = arith.constant 0 : index
    %c0_81 = arith.constant 0 : index
    %172 = vector.load %arg5[%c1, %c0_80, %c0_81] : memref<2x128x384xbf16, #tpu.memory_space<vmem>>, vector<1x128x384xbf16>
    %173 = vector.shape_cast %172 : vector<1x128x384xbf16> to vector<128x384xbf16>
    %174 = arith.truncf %171 : vector<16x128xf32> to vector<16x128xbf16>
    %cst_82 = arith.constant dense<0.000000e+00> : vector<16x384xf32>
    %175 = tpu.matmul %174, %173, %cst_82 {dimension_numbers = #tpu.dot_dimension_numbers<[1], [0], [0], [1], [0, 0, 1, 1], [], []>} : vector<16x128xbf16>, vector<128x384xbf16>, vector<16x384xf32> -> vector<16x384xf32>
    %c1_83 = arith.constant 1 : index
    %c0_84 = arith.constant 0 : index
    %c0_85 = arith.constant 0 : index
    %176 = vector.load %arg6[%c1_83, %c0_84, %c0_85] : memref<2x1x384xf32, #tpu.memory_space<vmem>>, vector<1x1x384xf32>
    %177 = vector.shape_cast %176 : vector<1x1x384xf32> to vector<1x384xf32>
    %178 = vector.broadcast %177 : vector<1x384xf32> to vector<16x384xf32>
    %179 = arith.addf %175, %178 : vector<16x384xf32>
    %180 = vector.extract_strided_slice %179 {offsets = [0, 0], sizes = [16, 64], strides = [1, 1]} : vector<16x384xf32> to vector<16x64xf32>
    %181 = vector.extract_strided_slice %179 {offsets = [0, 128], sizes = [16, 64], strides = [1, 1]} : vector<16x384xf32> to vector<16x64xf32>
    %182 = vector.extract_strided_slice %179 {offsets = [0, 256], sizes = [16, 64], strides = [1, 1]} : vector<16x384xf32> to vector<16x64xf32>
    %183 = arith.truncf %180 : vector<16x64xf32> to vector<16x64xbf16>
    %184 = arith.truncf %181 : vector<16x64xf32> to vector<16x64xbf16>
    %cst_86 = arith.constant dense<0.000000e+00> : vector<16x16xf32>
    %185 = tpu.matmul %183, %184, %cst_86 {dimension_numbers = #tpu.dot_dimension_numbers<[1], [1], [0], [0], [0, 0, 1, 0], [], []>} : vector<16x64xbf16>, vector<16x64xbf16>, vector<16x16xf32> -> vector<16x16xf32>
    %cst_87 = arith.constant 1.250000e-01 : f32
    %186 = vector.broadcast %cst_87 : f32 to vector<16x16xf32>
    %187 = arith.mulf %185, %186 : vector<16x16xf32>
    %188 = arith.addf %187, %25 : vector<16x16xf32>
    %cst_88 = arith.constant dense<0xFF800000> : vector<16xf32>
    %189 = vector.multi_reduction <maximumf>, %188, %cst_88 [1] : vector<16x16xf32> to vector<16xf32>
    %190 = vector.shape_cast %189 : vector<16xf32> to vector<16x1xf32>
    %191 = vector.broadcast %190 : vector<16x1xf32> to vector<16x16xf32>
    %192 = arith.subf %188, %191 : vector<16x16xf32>
    %193 = math.exp %192 : vector<16x16xf32>
    %cst_89 = arith.constant dense<0.000000e+00> : vector<16xf32>
    %194 = vector.multi_reduction <add>, %193, %cst_89 [1] : vector<16x16xf32> to vector<16xf32>
    %195 = vector.shape_cast %194 : vector<16xf32> to vector<16x1xf32>
    %196 = tpu.reciprocal %195 {approx = true} : vector<16x1xf32> -> vector<16x1xf32>
    %197 = vector.broadcast %196 : vector<16x1xf32> to vector<16x16xf32>
    %198 = arith.mulf %193, %197 : vector<16x16xf32>
    %199 = arith.truncf %198 : vector<16x16xf32> to vector<16x16xbf16>
    %200 = arith.truncf %182 : vector<16x64xf32> to vector<16x64xbf16>
    %cst_90 = arith.constant dense<0.000000e+00> : vector<16x64xf32>
    %201 = tpu.matmul %199, %200, %cst_90 {dimension_numbers = #tpu.dot_dimension_numbers<[1], [0], [0], [1], [0, 0, 1, 1], [], []>} : vector<16x16xbf16>, vector<16x64xbf16>, vector<16x64xf32> -> vector<16x64xf32>
    %c0_91 = arith.constant 0 : index
    %c0_92 = arith.constant 0 : index
    %202 = vector.load %arg22[%c0_91, %c0_92] : memref<16x128xf32, #tpu.memory_space<vmem>>, vector<16x64xf32>
    tpu.vector_store %arg22[%c0_91, %c0_92], %201 {strides = array<i32>} : memref<16x128xf32, #tpu.memory_space<vmem>>, vector<16x64xf32>,
    %203 = vector.extract_strided_slice %179 {offsets = [0, 64], sizes = [16, 64], strides = [1, 1]} : vector<16x384xf32> to vector<16x64xf32>
    %204 = vector.extract_strided_slice %179 {offsets = [0, 192], sizes = [16, 64], strides = [1, 1]} : vector<16x384xf32> to vector<16x64xf32>
    %205 = vector.extract_strided_slice %179 {offsets = [0, 320], sizes = [16, 64], strides = [1, 1]} : vector<16x384xf32> to vector<16x64xf32>
    %206 = arith.truncf %203 : vector<16x64xf32> to vector<16x64xbf16>
    %207 = arith.truncf %204 : vector<16x64xf32> to vector<16x64xbf16>
    %cst_93 = arith.constant dense<0.000000e+00> : vector<16x16xf32>
    %208 = tpu.matmul %206, %207, %cst_93 {dimension_numbers = #tpu.dot_dimension_numbers<[1], [1], [0], [0], [0, 0, 1, 0], [], []>} : vector<16x64xbf16>, vector<16x64xbf16>, vector<16x16xf32> -> vector<16x16xf32>
    %cst_94 = arith.constant 1.250000e-01 : f32
    %209 = vector.broadcast %cst_94 : f32 to vector<16x16xf32>
    %210 = arith.mulf %208, %209 : vector<16x16xf32>
    %211 = arith.addf %210, %25 : vector<16x16xf32>
    %cst_95 = arith.constant dense<0xFF800000> : vector<16xf32>
    %212 = vector.multi_reduction <maximumf>, %211, %cst_95 [1] : vector<16x16xf32> to vector<16xf32>
    %213 = vector.shape_cast %212 : vector<16xf32> to vector<16x1xf32>
    %214 = vector.broadcast %213 : vector<16x1xf32> to vector<16x16xf32>
    %215 = arith.subf %211, %214 : vector<16x16xf32>
    %216 = math.exp %215 : vector<16x16xf32>
    %cst_96 = arith.constant dense<0.000000e+00> : vector<16xf32>
    %217 = vector.multi_reduction <add>, %216, %cst_96 [1] : vector<16x16xf32> to vector<16xf32>
    %218 = vector.shape_cast %217 : vector<16xf32> to vector<16x1xf32>
    %219 = tpu.reciprocal %218 {approx = true} : vector<16x1xf32> -> vector<16x1xf32>
    %220 = vector.broadcast %219 : vector<16x1xf32> to vector<16x16xf32>
    %221 = arith.mulf %216, %220 : vector<16x16xf32>
    %222 = arith.truncf %221 : vector<16x16xf32> to vector<16x16xbf16>
    %223 = arith.truncf %205 : vector<16x64xf32> to vector<16x64xbf16>
    %cst_97 = arith.constant dense<0.000000e+00> : vector<16x64xf32>
    %224 = tpu.matmul %222, %223, %cst_97 {dimension_numbers = #tpu.dot_dimension_numbers<[1], [0], [0], [1], [0, 0, 1, 1], [], []>} : vector<16x16xbf16>, vector<16x64xbf16>, vector<16x64xf32> -> vector<16x64xf32>
    %c0_98 = arith.constant 0 : index
    %c64_99 = arith.constant 64 : index
    %225 = vector.load %arg22[%c0_98, %c64_99] : memref<16x128xf32, #tpu.memory_space<vmem>>, vector<16x64xf32>
    tpu.vector_store %arg22[%c0_98, %c64_99], %224 {strides = array<i32>} : memref<16x128xf32, #tpu.memory_space<vmem>>, vector<16x64xf32>,
    %c0_100 = arith.constant 0 : index
    %c0_101 = arith.constant 0 : index
    %226 = vector.load %arg22[%c0_100, %c0_101] : memref<16x128xf32, #tpu.memory_space<vmem>>, vector<16x128xf32>
    %c1_102 = arith.constant 1 : index
    %c0_103 = arith.constant 0 : index
    %c0_104 = arith.constant 0 : index
    %227 = vector.load %arg7[%c1_102, %c0_103, %c0_104] : memref<2x128x128xbf16, #tpu.memory_space<vmem>>, vector<1x128x128xbf16>
    %228 = vector.shape_cast %227 : vector<1x128x128xbf16> to vector<128x128xbf16>
    %229 = arith.truncf %226 : vector<16x128xf32> to vector<16x128xbf16>
    %cst_105 = arith.constant dense<0.000000e+00> : vector<16x128xf32>
    %230 = tpu.matmul %229, %228, %cst_105 {dimension_numbers = #tpu.dot_dimension_numbers<[1], [0], [0], [1], [0, 0, 1, 1], [], []>} : vector<16x128xbf16>, vector<128x128xbf16>, vector<16x128xf32> -> vector<16x128xf32>
    %c1_106 = arith.constant 1 : index
    %c0_107 = arith.constant 0 : index
    %c0_108 = arith.constant 0 : index
    %231 = vector.load %arg8[%c1_106, %c0_107, %c0_108] : memref<2x1x128xf32, #tpu.memory_space<vmem>>, vector<1x1x128xf32>
    %232 = vector.shape_cast %231 : vector<1x1x128xf32> to vector<1x128xf32>
    %233 = vector.broadcast %232 : vector<1x128xf32> to vector<16x128xf32>
    %234 = arith.addf %230, %233 : vector<16x128xf32>
    %235 = arith.addf %234, %171 : vector<16x128xf32>
    %c1_109 = arith.constant 1 : index
    %c0_110 = arith.constant 0 : index
    %c0_111 = arith.constant 0 : index
    %236 = vector.load %arg9[%c1_109, %c0_110, %c0_111] : memref<2x1x128xf32, #tpu.memory_space<vmem>>, vector<1x1x128xf32>
    %237 = vector.shape_cast %236 : vector<1x1x128xf32> to vector<1x128xf32>
    %c1_112 = arith.constant 1 : index
    %c0_113 = arith.constant 0 : index
    %c0_114 = arith.constant 0 : index
    %238 = vector.load %arg10[%c1_112, %c0_113, %c0_114] : memref<2x1x128xf32, #tpu.memory_space<vmem>>, vector<1x1x128xf32>
    %239 = vector.shape_cast %238 : vector<1x1x128xf32> to vector<1x128xf32>
    %cst_115 = arith.constant dense<0.000000e+00> : vector<16xf32>
    %240 = vector.multi_reduction <add>, %235, %cst_115 [1] : vector<16x128xf32> to vector<16xf32>
    %241 = vector.shape_cast %240 : vector<16xf32> to vector<16x1xf32>
    %cst_116 = arith.constant 1.280000e+02 : f32
    %242 = vector.broadcast %cst_116 : f32 to vector<16x1xf32>
    %243 = arith.divf %241, %242 : vector<16x1xf32>
    %244 = vector.broadcast %243 : vector<16x1xf32> to vector<16x128xf32>
    %245 = arith.subf %235, %244 : vector<16x128xf32>
    %246 = arith.mulf %245, %245 : vector<16x128xf32>
    %cst_117 = arith.constant dense<0.000000e+00> : vector<16xf32>
    %247 = vector.multi_reduction <add>, %246, %cst_117 [1] : vector<16x128xf32> to vector<16xf32>
    %248 = vector.shape_cast %247 : vector<16xf32> to vector<16x1xf32>
    %cst_118 = arith.constant 1.280000e+02 : f32
    %249 = vector.broadcast %cst_118 : f32 to vector<16x1xf32>
    %250 = arith.divf %248, %249 : vector<16x1xf32>
    %251 = vector.broadcast %243 : vector<16x1xf32> to vector<16x128xf32>
    %252 = arith.subf %235, %251 : vector<16x128xf32>
    %cst_119 = arith.constant 9.99999996E-13 : f32
    %253 = vector.broadcast %cst_119 : f32 to vector<16x1xf32>
    %254 = arith.addf %250, %253 : vector<16x1xf32>
    %255 = math.rsqrt %254 : vector<16x1xf32>
    %256 = vector.broadcast %255 : vector<16x1xf32> to vector<16x128xf32>
    %257 = arith.mulf %252, %256 : vector<16x128xf32>
    %258 = vector.broadcast %237 : vector<1x128xf32> to vector<16x128xf32>
    %259 = arith.mulf %257, %258 : vector<16x128xf32>
    %260 = vector.broadcast %239 : vector<1x128xf32> to vector<16x128xf32>
    %261 = arith.addf %259, %260 : vector<16x128xf32>
    %c1_120 = arith.constant 1 : index
    %c0_121 = arith.constant 0 : index
    %c0_122 = arith.constant 0 : index
    %262 = vector.load %arg11[%c1_120, %c0_121, %c0_122] : memref<2x128x256xbf16, #tpu.memory_space<vmem>>, vector<1x128x256xbf16>
    %263 = vector.shape_cast %262 : vector<1x128x256xbf16> to vector<128x256xbf16>
    %264 = arith.truncf %261 : vector<16x128xf32> to vector<16x128xbf16>
    %cst_123 = arith.constant dense<0.000000e+00> : vector<16x256xf32>
    %265 = tpu.matmul %264, %263, %cst_123 {dimension_numbers = #tpu.dot_dimension_numbers<[1], [0], [0], [1], [0, 0, 1, 1], [], []>} : vector<16x128xbf16>, vector<128x256xbf16>, vector<16x256xf32> -> vector<16x256xf32>
    %c1_124 = arith.constant 1 : index
    %c0_125 = arith.constant 0 : index
    %c0_126 = arith.constant 0 : index
    %266 = vector.load %arg12[%c1_124, %c0_125, %c0_126] : memref<2x1x256xf32, #tpu.memory_space<vmem>>, vector<1x1x256xf32>
    %267 = vector.shape_cast %266 : vector<1x1x256xf32> to vector<1x256xf32>
    %268 = vector.broadcast %267 : vector<1x256xf32> to vector<16x256xf32>
    %269 = arith.addf %265, %268 : vector<16x256xf32>
    %cst_127 = arith.constant 5.000000e-01 : f32
    %270 = vector.broadcast %cst_127 : f32 to vector<16x256xf32>
    %271 = arith.mulf %270, %269 : vector<16x256xf32>
    %cst_128 = arith.constant 4.471500e-02 : f32
    %272 = vector.broadcast %cst_128 : f32 to vector<16x256xf32>
    %273 = arith.mulf %272, %269 : vector<16x256xf32>
    %274 = arith.mulf %273, %269 : vector<16x256xf32>
    %275 = arith.mulf %274, %269 : vector<16x256xf32>
    %276 = arith.addf %269, %275 : vector<16x256xf32>
    %cst_129 = arith.constant 0.797884583 : f32
    %277 = vector.broadcast %cst_129 : f32 to vector<16x256xf32>
    %278 = arith.mulf %277, %276 : vector<16x256xf32>
    %279 = math.tanh %278 : vector<16x256xf32>
    %cst_130 = arith.constant 1.000000e+00 : f32
    %280 = vector.broadcast %cst_130 : f32 to vector<16x256xf32>
    %281 = arith.addf %280, %279 : vector<16x256xf32>
    %282 = arith.mulf %271, %281 : vector<16x256xf32>
    %c1_131 = arith.constant 1 : index
    %c0_132 = arith.constant 0 : index
    %c0_133 = arith.constant 0 : index
    %283 = vector.load %arg13[%c1_131, %c0_132, %c0_133] : memref<2x256x128xbf16, #tpu.memory_space<vmem>>, vector<1x256x128xbf16>
    %284 = vector.shape_cast %283 : vector<1x256x128xbf16> to vector<256x128xbf16>
    %285 = arith.truncf %282 : vector<16x256xf32> to vector<16x256xbf16>
    %cst_134 = arith.constant dense<0.000000e+00> : vector<16x128xf32>
    %286 = tpu.matmul %285, %284, %cst_134 {dimension_numbers = #tpu.dot_dimension_numbers<[1], [0], [0], [1], [0, 0, 1, 1], [], []>} : vector<16x256xbf16>, vector<256x128xbf16>, vector<16x128xf32> -> vector<16x128xf32>
    %c1_135 = arith.constant 1 : index
    %c0_136 = arith.constant 0 : index
    %c0_137 = arith.constant 0 : index
    %287 = vector.load %arg14[%c1_135, %c0_136, %c0_137] : memref<2x1x128xf32, #tpu.memory_space<vmem>>, vector<1x1x128xf32>
    %288 = vector.shape_cast %287 : vector<1x1x128xf32> to vector<1x128xf32>
    %289 = vector.broadcast %288 : vector<1x128xf32> to vector<16x128xf32>
    %290 = arith.addf %286, %289 : vector<16x128xf32>
    %291 = arith.addf %290, %261 : vector<16x128xf32>
    %c1_138 = arith.constant 1 : index
    %c0_139 = arith.constant 0 : index
    %c0_140 = arith.constant 0 : index
    %292 = vector.load %arg15[%c1_138, %c0_139, %c0_140] : memref<2x1x128xf32, #tpu.memory_space<vmem>>, vector<1x1x128xf32>
    %293 = vector.shape_cast %292 : vector<1x1x128xf32> to vector<1x128xf32>
    %c1_141 = arith.constant 1 : index
    %c0_142 = arith.constant 0 : index
    %c0_143 = arith.constant 0 : index
    %294 = vector.load %arg16[%c1_141, %c0_142, %c0_143] : memref<2x1x128xf32, #tpu.memory_space<vmem>>, vector<1x1x128xf32>
    %295 = vector.shape_cast %294 : vector<1x1x128xf32> to vector<1x128xf32>
    %cst_144 = arith.constant dense<0.000000e+00> : vector<16xf32>
    %296 = vector.multi_reduction <add>, %291, %cst_144 [1] : vector<16x128xf32> to vector<16xf32>
    %297 = vector.shape_cast %296 : vector<16xf32> to vector<16x1xf32>
    %cst_145 = arith.constant 1.280000e+02 : f32
    %298 = vector.broadcast %cst_145 : f32 to vector<16x1xf32>
    %299 = arith.divf %297, %298 : vector<16x1xf32>
    %300 = vector.broadcast %299 : vector<16x1xf32> to vector<16x128xf32>
    %301 = arith.subf %291, %300 : vector<16x128xf32>
    %302 = arith.mulf %301, %301 : vector<16x128xf32>
    %cst_146 = arith.constant dense<0.000000e+00> : vector<16xf32>
    %303 = vector.multi_reduction <add>, %302, %cst_146 [1] : vector<16x128xf32> to vector<16xf32>
    %304 = vector.shape_cast %303 : vector<16xf32> to vector<16x1xf32>
    %cst_147 = arith.constant 1.280000e+02 : f32
    %305 = vector.broadcast %cst_147 : f32 to vector<16x1xf32>
    %306 = arith.divf %304, %305 : vector<16x1xf32>
    %307 = vector.broadcast %299 : vector<16x1xf32> to vector<16x128xf32>
    %308 = arith.subf %291, %307 : vector<16x128xf32>
    %cst_148 = arith.constant 9.99999996E-13 : f32
    %309 = vector.broadcast %cst_148 : f32 to vector<16x1xf32>
    %310 = arith.addf %306, %309 : vector<16x1xf32>
    %311 = math.rsqrt %310 : vector<16x1xf32>
    %312 = vector.broadcast %311 : vector<16x1xf32> to vector<16x128xf32>
    %313 = arith.mulf %308, %312 : vector<16x128xf32>
    %314 = vector.broadcast %293 : vector<1x128xf32> to vector<16x128xf32>
    %315 = arith.mulf %313, %314 : vector<16x128xf32>
    %316 = vector.broadcast %295 : vector<1x128xf32> to vector<16x128xf32>
    %317 = arith.addf %315, %316 : vector<16x128xf32>
    %c0_149 = arith.constant 0 : index
    %c0_150 = arith.constant 0 : index
    %318 = vector.load %arg2[%c0_149, %c0_150] : memref<2x16xbf16, #tpu.memory_space<vmem>>, vector<2x16xbf16>
    %319 = arith.truncf %317 : vector<16x128xf32> to vector<16x128xbf16>
    %cst_151 = arith.constant dense<0.000000e+00> : vector<2x128xf32>
    %320 = tpu.matmul %318, %319, %cst_151 {dimension_numbers = #tpu.dot_dimension_numbers<[1], [0], [0], [1], [0, 0, 1, 1], [], []>} : vector<2x16xbf16>, vector<16x128xbf16>, vector<2x128xf32> -> vector<2x128xf32>
    %c0_152 = arith.constant 0 : index
    %c0_153 = arith.constant 0 : index
    %321 = vector.load %arg17[%c0_152, %c0_153] : memref<128x128xbf16, #tpu.memory_space<vmem>>, vector<128x128xbf16>
    %322 = arith.truncf %320 : vector<2x128xf32> to vector<2x128xbf16>
    %cst_154 = arith.constant dense<0.000000e+00> : vector<2x128xf32>
    %323 = tpu.matmul %322, %321, %cst_154 {dimension_numbers = #tpu.dot_dimension_numbers<[1], [0], [0], [1], [0, 0, 1, 1], [], []>} : vector<2x128xbf16>, vector<128x128xbf16>, vector<2x128xf32> -> vector<2x128xf32>
    %c0_155 = arith.constant 0 : index
    %c0_156 = arith.constant 0 : index
    %324 = vector.load %arg18[%c0_155, %c0_156] : memref<1x128xf32, #tpu.memory_space<vmem>>, vector<1x128xf32>
    %325 = vector.broadcast %324 : vector<1x128xf32> to vector<2x128xf32>
    %326 = arith.addf %323, %325 : vector<2x128xf32>
    %327 = math.tanh %326 : vector<2x128xf32>
    %c0_157 = arith.constant 0 : index
    %c0_158 = arith.constant 0 : index
    %328 = vector.load %arg19[%c0_157, %c0_158] : memref<128x128xbf16, #tpu.memory_space<vmem>>, vector<128x128xbf16>
    %329 = arith.truncf %327 : vector<2x128xf32> to vector<2x128xbf16>
    %cst_159 = arith.constant dense<0.000000e+00> : vector<2x128xf32>
    %330 = tpu.matmul %329, %328, %cst_159 {dimension_numbers = #tpu.dot_dimension_numbers<[1], [0], [0], [1], [0, 0, 1, 1], [], []>} : vector<2x128xbf16>, vector<128x128xbf16>, vector<2x128xf32> -> vector<2x128xf32>
    %c0_160 = arith.constant 0 : index
    %c0_161 = arith.constant 0 : index
    %331 = vector.load %arg20[%c0_160, %c0_161] : memref<1x128xf32, #tpu.memory_space<vmem>>, vector<1x128xf32>
    %332 = vector.broadcast %331 : vector<1x128xf32> to vector<2x128xf32>
    %333 = arith.addf %330, %332 : vector<2x128xf32>
    %c0_162 = arith.constant 0 : index
    %c0_163 = arith.constant 0 : index
    %334 = vector.load %arg21[%c0_162, %c0_163] : memref<2x128xf32, #tpu.memory_space<vmem>>, vector<2x128xf32>
    tpu.vector_store %arg21[%c0_162, %c0_163], %333 {strides = array<i32>} : memref<2x128xf32, #tpu.memory_space<vmem>>, vector<2x128xf32>,
    return
  }
}

</mosaic_0001>

<bundles_post_ra>
// kernel: bert_forward.1
= control target key start
LH: loop header
LB: loop body
LE: loop exit
PB: predicated region body
PF: predicated region fallthrough
CT: control target
= control target key end

     0   :  { %s4094_s0 = inlined_call_operand.vmem [shape: f32[16,128], index: 0, kind: input, shape index: {}]   ;;  %s4095_s1 = inlined_call_operand.vmem [shape: f32[16,16], index: 1, kind: input, shape index: {}]   ;;  %s4096_s2 = inlined_call_operand.vmem [shape: bf16[2,16], index: 2, kind: input, shape index: {}]   ;;  %s4097_s3 = inlined_call_operand.vmem [shape: f32[1,128], index: 3, kind: input, shape index: {}]   ;;  %s4098_s4 = inlined_call_operand.vmem [shape: f32[1,128], index: 4, kind: input, shape index: {}]   ;;  %s4099_s5 = inlined_call_operand.hbm [shape: bf16[2,128,384], index: 5, kind: input, shape index: {}]   ;;  %s4100_s6 = inlined_call_operand.vmem [shape: f32[2,1,384], index: 6, kind: input, shape index: {}]   ;;  %s4101_s7 = inlined_call_operand.vmem [shape: bf16[2,128,128], index: 7, kind: input, shape index: {}]   ;;  %s4102_s8 = inlined_call_operand.vmem [shape: f32[2,1,128], index: 8, kind: input, shape index: {}]   ;;  %s4103_s9 = inlined_call_operand.vmem [shape: f32[2,1,128], index: 9, kind: input, shape index: {}]   ;;  %s4104_s10 = inlined_call_operand.vmem [shape: f32[2,1,128], index: 10, kind: input, shape index: {}]   ;;  %s4105_s11 = inlined_call_operand.vmem [shape: bf16[2,128,256], index: 11, kind: input, shape index: {}]   ;;  %s4106_s12 = inlined_call_operand.vmem [shape: f32[2,1,256], index: 12, kind: input, shape index: {}]   ;;  %s4107_s13 = inlined_call_operand.hbm [shape: bf16[2,256,128], index: 13, kind: input, shape index: {}]   ;;  %s4108_s14 = inlined_call_operand.vmem [shape: f32[2,1,128], index: 14, kind: input, shape index: {}]   ;;  %s4109_s15 = inlined_call_operand.vmem [shape: f32[2,1,128], index: 15, kind: input, shape index: {}]   ;;  %s4110_s16 = inlined_call_operand.vmem [shape: f32[2,1,128], index: 16, kind: input, shape index: {}]   ;;  %s4111_s17 = inlined_call_operand.vmem [shape: bf16[128,128], index: 17, kind: input, shape index: {}]   ;;  %s4112_s18 = inlined_call_operand.vmem [shape: f32[1,128], index: 18, kind: input, shape index: {}]   ;;  %s4113_s19 = inlined_call_operand.vmem [shape: bf16[128,128], index: 19, kind: input, shape index: {}]   ;;  %s4114_s20 = inlined_call_operand.vmem [shape: f32[1,128], index: 20, kind: input, shape index: {}]   ;;  %s4115_s21 = inlined_call_operand.hbm [shape: f32[2,128], index: 21, kind: output, shape index: {}]  }
   0x1   :  { %4120 = sst [smem:[#allocation12_spill]] %s4094_s0 }
   0x2   :  { %4121 = sst [smem:[#allocation13_spill]] %s4095_s1 }
   0x3   :  { %4122 = sst [smem:[#allocation14_spill]] %s4096_s2 }
   0x4   :  { %4123 = sst [smem:[#allocation15_spill]] %s4097_s3 }
   0x5   :  { %4124 = sst [smem:[#allocation16_spill]] %s4098_s4 }
   0x6   :  { %4125 = sst [smem:[#allocation17_spill]] %s4099_s5 }
   0x7   :  { %4126 = sst [smem:[#allocation18_spill]] %s4115_s21 }
   0x8   :  { %26 = vsyncpa [#allocation4], 0 }
   0x9   :  { %27 = vsyncpa [#allocation7], 0 }
   0xa   :  { %28 = vsyncpa [#allocation5], 0  ;;  %s3448_s2 = smov [#allocation3]   ;;  %s4127_s3 = sld [smem:[#allocation17_spill]] }
   0xb   :  { %s44_s25 = sshll.u32 %s3448_s2, 4  ;;  %s45_s25 = int_to_ptr.vmem [resolvable:$true] %s44_s25 }
  0x10   :  { %s3376_s28 = scalar_lea.hbm %s4127_s3, 6144 }
  0x11   :  { %p3377_p0 = scmp.ne.s32.totalorder %s4127_s3, %s3376_s28  ;;  %p3380_p1 = scmp.lt.u32.totalorder %s3376_s28, %s4127_s3 }
  0x13   :  { %p3382_p2 = pnand %p3380_p1, %p3377_p0 }
  0x15   :  { %3385 = shalt.err (!%p3382_p2)
}
  0x16   :  { %s3386_s5 = scalar_lea.vmem %s45_s25, 6144  ;;  %p3391_p4 = scmp.lt.s32.totalorder %s45_s25, %s45_s25 }
  0x17   :  { %p3387_p3 = scmp.ne.s32.totalorder %s45_s25, %s3386_s5  ;;  %p3392_p5 = scmp.lt.s32.totalorder %s3386_s5, %s3386_s5 }
  0x19   :  { %p3393_p6 = por %p3392_p5, %p3391_p4 }
  0x1b   :  { %p3394_p7 = pnand %p3393_p6, %p3387_p3 }
  0x1d   :  { %3397 = shalt.err (!%p3394_p7)
}
  0x1e   :  { %s3449_s22 = smov 192   ;;  %s3450_s23 = smov 12  }
  0x1f   :  { %50 = dma.hbm_to_vmem [thread:$0]  %s4127_s3, 6144, %s45_s25, [#allocation4], %s3449_s22, %s3449_s22, %s3450_s23  }
  0x20   :  { %s3451_s2 = smov [#allocation6]   ;;  %s3398_s29 = scalar_lea.hbm %s4107_s13, 4096 }
  0x21   :  { %s70_s26 = sshll.u32 %s3451_s2, 4  ;;  %p3399_p8 = scmp.ne.s32.totalorder %s4107_s13, %s3398_s29  ;;  %s71_s26 = int_to_ptr.vmem [resolvable:$true] %s70_s26 }
  0x22   :  { %p3402_p9 = scmp.lt.u32.totalorder %s3398_s29, %s4107_s13 }
  0x24   :  { %p3404_p10 = pnand %p3402_p9, %p3399_p8 }
  0x26   :  { %3407 = shalt.err (!%p3404_p10)
}
  0x27   :  { %s3408_s21 = scalar_lea.vmem %s71_s26, 4096  ;;  %p3413_p12 = scmp.lt.s32.totalorder %s71_s26, %s71_s26 }
  0x28   :  { %p3409_p11 = scmp.ne.s32.totalorder %s71_s26, %s3408_s21  ;;  %p3414_p13 = scmp.lt.s32.totalorder %s3408_s21, %s3408_s21 }
  0x2a   :  { %p3415_p0 = por %p3414_p13, %p3413_p12 }
  0x2c   :  { %p3416_p1 = pnand %p3415_p0, %p3409_p11 }
  0x2e   :  { %3419 = shalt.err (!%p3416_p1)
}
  0x2f   :  { %s3452_s25 = smov 64   ;;  %s3453_s3 = smov 4  }
  0x30   :  { %76 = dma.hbm_to_vmem [thread:$0]  %s4107_s13, 4096, %s71_s26, [#allocation7], %s3452_s25, %s3452_s25, %s3453_s3  }
  0x31   :  { %3442 = dma.done.wait [#allocation4], 6144  }
  0x32   :  { %3443 = vsyncadd [#allocation4], 4294961152 }
  0x33   :  { %3444 = dma.done.wait [#allocation7], 4096  }
  0x34   :  { %3445 = vsyncadd [#allocation7], 4294963200  ;;  %s4128_s2 = sld [smem:[#allocation12_spill]]  ;;  %v3130_v2 = vld [vmem:[#allocation3 + $0x4] ss:$12 sps:$4 sm:$0xff]   ;;  %v3454_v4 = vmov 0.0   ;;  %v178_v53 = vlaneseq }
  0x35   :  { %v3132_v3 = vld [vmem:[#allocation3] ss:$12 sps:$4 sm:$0xff]   ;;  %2946 = vmatprep.subr.bf16.mxu1 %v3454_v4  ;;  %v3133_v5 = vld [vmem:[#allocation3 + $0x8] ss:$12 sps:$4 sm:$0xff]   ;;  %321 = vmatprep.subr.bf16.mxu0 %v3130_v2  ;;  %v3136_v15 = vld [vmem:[#allocation3 + $0x18] ss:$12 sps:$4 sm:$0xff]  }
  0x36   :  { %v3134_v6 = vld [vmem:[#allocation3 + $0x1c] ss:$12 sps:$4 sm:$0xff]   ;;  %322 = vmatpush1.bf16.msra.mxu0 %v3132_v3  ;;  %2947 = vmatpush3.bf16.msra.mxu1 %v3133_v5  ;;  %v3137_v16 = vld [vmem:[#allocation3 + $0x20] ss:$12 sps:$4 sm:$0xff]   ;;  %v3141_v19 = vld [vmem:[#allocation3 + $0x38] ss:$12 sps:$4 sm:$0xff]  }
  0x37   :  { %323 = vmatprep.subr.bf16.mxu0 %v3134_v6  ;;  %2948 = vmatprep.subr.bf16.mxu1 %v3454_v4  ;;  %v3138_v17 = vld [vmem:[#allocation3 + $0x34] ss:$12 sps:$4 sm:$0xff]   ;;  %v3140_v18 = vld [vmem:[#allocation3 + $0x30] ss:$12 sps:$4 sm:$0xff]   ;;  %v3142_v20 = vld [vmem:[#allocation3 + $0x4c] ss:$12 sps:$4 sm:$0xff]  }
  0x38   :  { %v3144_v21 = vld [vmem:[#allocation3 + $0x48] ss:$12 sps:$4 sm:$0xff]   ;;  %v3145_v22 = vld [vmem:[#allocation3 + $0x50] ss:$12 sps:$4 sm:$0xff]   ;;  %v3148_v24 = vld [vmem:[#allocation3 + $0x60] ss:$12 sps:$4 sm:$0xff]  }
  0x39   :  { %v3146_v23 = vld [vmem:[#allocation3 + $0x64] ss:$12 sps:$4 sm:$0xff]   ;;  %v3149_v25 = vld [vmem:[#allocation3 + $0x68] ss:$12 sps:$4 sm:$0xff]   ;;  %v3153_v28 = vld [vmem:[#allocation3 + $0x80] ss:$12 sps:$4 sm:$0xff]  }
  0x3a   :  { %v98_v0 = vld [vmem:[%s4128_s2] sm:$0xff]  ;;  %v99_v1 = vld [vmem:[%s4128_s2 + $0x8] sm:$0xff]  ;;  %324 = vmatpush1.bf16.msra.mxu0 %v3136_v15  ;;  %2949 = vmatpush3.bf16.msra.mxu1 %v3137_v16  ;;  %v3455_v30 = vmov 0   ;;  %vm3456_vm0 = vmmov 0   ;;  %s4129_s28 = sld [smem:[#allocation15_spill]]  ;;  %s4130_s4 = sld [smem:[#allocation16_spill]] }
  0x3b   :  { %102 = vadd.xlane.f32.xlu0 %v98_v0  ;;  %2950 = vmatprep.subr.bf16.mxu1 %v3454_v4  ;;  %v3150_v26 = vld [vmem:[#allocation3 + $0x7c] ss:$12 sps:$4 sm:$0xff]   ;;  %v3152_v27 = vld [vmem:[#allocation3 + $0x78] ss:$12 sps:$4 sm:$0xff]   ;;  %v3154_v29 = vld [vmem:[#allocation3 + $0x94] ss:$12 sps:$4 sm:$0xff]  }
  0x3c   :  { %325 = vmatprep.subr.bf16.mxu0 %v3138_v17  ;;  %353 = vmatprep.mubr.bf16.mxu0 %v3455_v30  ;;  %v3156_v31 = vld [vmem:[#allocation3 + $0x90] ss:$12 sps:$4 sm:$0xff]   ;;  %v3157_v32 = vld [vmem:[#allocation3 + $0x98] ss:$12 sps:$4 sm:$0xff]   ;;  %v3160_v34 = vld [vmem:[#allocation3 + $0xa8] ss:$12 sps:$4 sm:$0xff]  }
  0x3d   :  { %2962 = vmatprep.mubr.msk.bf16.mxu1 %vm3456_vm0, %v3454_v4  ;;  %v3158_v33 = vld [vmem:[#allocation3 + $0xac] ss:$12 sps:$4 sm:$0xff]   ;;  %v3161_v35 = vld [vmem:[#allocation3 + $0xb0] ss:$12 sps:$4 sm:$0xff]   ;;  %v3639_v54 = vshrl.u32 %v178_v53, 7  ;;  %vm407_vm1 = vcmask 523264  }
  0x3e   :  { %326 = vmatpush1.bf16.msra.mxu0 %v3140_v18  ;;  %2951 = vmatpush3.bf16.msra.mxu1 %v3141_v19  ;;  %v176_v57 = vld [vmem:[%s4100_s6] sm:$0x7]  ;;  %s4131_s23 = sld [smem:[#allocation13_spill]]  ;;  %vm459_vm2 = vcmask 130048   ;;  %vm666_vm3 = vcmask 1048064  }
  0x3f   :  { %104 = vadd.xlane.f32.xlu0 %v99_v1  ;;  %2952 = vmatprep.subr.bf16.mxu1 %v3454_v4  ;;  %v3642_v55 = vsub.s32 0, %v3639_v54  ;;  %v188_v56 = vsub.s32 2, %v3639_v54  ;;  %v3649_v58 = vsub.s32 1, %v3639_v54 }
  0x40   :  { %327 = vmatprep.subr.bf16.mxu0 %v3142_v20  ;;  %v2621_v44 = vld [vmem:[%s4129_s28] ss:$0 sm:$0xff]  ;;  %s3457_s28 = smov [#allocation8]  }
  0x41   :  { %v2622_v48 = vld [vmem:[%s4130_s4] ss:$0 sm:$0xff]  ;;  %v181_v59 = vrot.slane %v176_v57, %v3642_v55  ;;  %v189_v60 = vrot.slane %v176_v57, %v188_v56  ;;  %v185_v63 = vrot.slane %v176_v57, %v3649_v58 }
  0x42   :  { %328 = vmatpush1.bf16.msra.mxu0 %v3144_v21  ;;  %2953 = vmatpush3.bf16.msra.mxu1 %v3145_v22 }
  0x43   :  { %2954 = vmatprep.subr.bf16.mxu1 %v3454_v4  ;;  %329 = vmatprep.subr.bf16.mxu0 %v3146_v23 }
  0x44   :  { %v3674_v21 = vld [vmem:[%s4131_s23] sm:$0xff] }
  0x46   :  { %330 = vmatpush1.bf16.msra.mxu0 %v3148_v24  ;;  %2955 = vmatpush3.bf16.msra.mxu1 %v3149_v25  ;;  %v3679_v25 = vld [vmem:[%s4131_s23 + $0x8] sm:$0xff] }
  0x47   :  { %331 = vmatprep.subr.bf16.mxu0 %v3150_v26  ;;  %2956 = vmatprep.subr.bf16.mxu1 %v3454_v4 }
  0x4a   :  { %332 = vmatpush1.bf16.msra.mxu0 %v3152_v27  ;;  %2957 = vmatpush3.bf16.msra.mxu1 %v3153_v28 }
  0x4b   :  { %333 = vmatprep.subr.bf16.mxu0 %v3154_v29  ;;  %2958 = vmatprep.subr.bf16.mxu1 %v3454_v4 }
  0x4e   :  { %334 = vmatpush1.bf16.msra.mxu0 %v3156_v31  ;;  %2959 = vmatpush3.bf16.msra.mxu1 %v3157_v32 }
  0x4f   :  { %335 = vmatprep.subr.bf16.mxu0 %v3158_v33  ;;  %2960 = vmatprep.subr.bf16.mxu1 %v3454_v4 }
  0x52   :  { %336 = vmatpush1.bf16.msra.mxu0 %v3160_v34  ;;  %2961 = vmatpush3.bf16.msra.mxu1 %v3161_v35 }
  0x53   :  { %2966 = vmatprep.subr.bf16.mxu1 %v3454_v4  ;;  %2978 = vmatprep.subr.bf16.mxu0 %v3454_v4 }
  0xc8   :  { %v103_v7 = vpop.xlane.xlu0 %102 }
  0xc9   :  { %v107_v8 = vmul.f32 0.0078125, %v103_v7 }
  0xcb   :  { %v3602_v9 = vsub.f32 %v98_v0, %v107_v8 }
  0xcc   :  { %v105_v10 = vpop.xlane.xlu0 %104 }
  0xcd   :  { %v108_v11 = vmul.f32 0.0078125, %v105_v10  ;;  %v111_v12 = vmul.f32 %v3602_v9, %v3602_v9 }
  0xcf   :  { %v3606_v13 = vsub.f32 %v99_v1, %v108_v11  ;;  %113 = vadd.xlane.f32.xlu1 %v111_v12 }
  0xd1   :  { %v112_v14 = vmul.f32 %v3606_v13, %v3606_v13 }
  0xd3   :  { %115 = vadd.xlane.f32.xlu1 %v112_v14 }
 0x15c   :  { %v114_v36 = vpop.xlane.xlu1 %113 }
 0x15d   :  { %v117_v37 = vmul.f32 0.0078125, %v114_v36 }
 0x15f   :  { %v119_v38 = vadd.f32 1e-12, %v117_v37 }
 0x160   :  { %v116_v39 = vpop.xlane.xlu1 %115 }
 0x161   :  { %3306 = vrsqrt.f32 %v119_v38  ;;  %v118_v40 = vmul.f32 0.0078125, %v116_v39 }
 0x163   :  { %v120_v41 = vadd.f32 1e-12, %v118_v40 }
 0x165   :  { %3308 = vrsqrt.f32 %v120_v41 }
 0x16b   :  { %v3307_v42 = vpop.eup %3306 }
 0x16c   :  { %v123_v43 = vmul.f32 %v3307_v42, %v3602_v9 }
 0x16e   :  { %v131_v47 = vmul.f32 %v2621_v44, %v123_v43 }
 0x16f   :  { %v3309_v45 = vpop.eup %3308 }
 0x170   :  { %v124_v46 = vmul.f32 %v3309_v45, %v3606_v13  ;;  %v3629_v50 = vadd.f32 %v2622_v48, %v131_v47 }
 0x172   :  { %v132_v49 = vmul.f32 %v2621_v44, %v124_v46 }
 0x174   :  { %v3631_v51 = vadd.f32 %v2622_v48, %v132_v49 }
 0x176   :  { %v175_v52 = vpack.c.bf16 %v3631_v51, %v3629_v50 }
 0x178   :  { %354 = vmatmul.mubr.bf16.vlgmr.msra.gmra.mrb[0].mxu0 %v175_v52  ;;  %2963 = vmatmul.mubr.bf16.vlgmr.msra.gmra.mrb[0].mxu1 %v175_v52 }
 0x179   :  { %2968 = vmatprep.mubr.msk.bf16.mxu1 %vm3456_vm0, %v3454_v4  ;;  %2980 = vmatprep.mubr.msk.bf16.mxu0 %vm3456_vm0, %v3454_v4 }
 0x24b   :  { %v355_v61 = vpop.f32.mrb[0].mxu0  ;;  %v398_v62 = vpop.f32.mrb[0].mxu1 }
 0x24c   :  { %v357_v0 = vpop.f32.mrb[1].mxu0  ;;  %v2964_v1 = vpop.f32.mrb[1].mxu1  ;;  %v356_v5 = vadd.f32 %v355_v61, %v181_v59  ;;  %v399_v6 = vadd.f32 %v398_v62, %v189_v60 }
 0x24d   :  { %v359_v2 = vpop.f32.mrb[2].mxu0  ;;  %v401_v3 = vpop.f32.mrb[2].mxu1  ;;  %v358_v11 = vadd.f32 %v357_v0, %v185_v63 }
 0x24e   :  { %v360_v7 = vadd.f32 %v359_v2, %v181_v59  ;;  %v402_v8 = vadd.f32 %v401_v3, %v189_v60  ;;  %v361_v9 = vpop.f32.mrb[3].mxu0  ;;  %v2965_v10 = vpop.f32.mrb[3].mxu1 }
 0x24f   :  { %v362_v12 = vadd.f32 %v361_v9, %v185_v63 }
 0x250   :  { %v3655_v13 = vpack.c.bf16 %v402_v8, %v399_v6  ;;  %v405_v14 = vpack.c.bf16 %v360_v7, %v356_v5 }
 0x251   :  { %v406_v15 = vpack.c.bf16 %v362_v12, %v358_v11 }
 0x252   :  { %531 = vrot.lane.b32.xlu1 %v405_v14, %s3452_s25 }
 0x253   :  { %534 = vrot.lane.b32.xlu0 %v406_v15, %s3452_s25  ;;  %v412_v16 = vsel %vm407_vm1, %v406_v15, 0 }
 0x254   :  { %2967 = vmatpush3.bf16.xpose.msra.mxu1 %v412_v16 }
 0x255   :  { %2972 = vmatprep.subr.bf16.mxu1 %v3454_v4 }
 0x25b   :  { %2969 = vmatmul.mubr.msk.bf16.vlgmr.msra.gmra.mrb[4].mxu1 %vm407_vm1, %v405_v14 }
 0x25c   :  { %2973 = vmatpush3.bf16.msra.mxu1 %v3655_v13  ;;  %2974 = vmatprep.mubr.msk.bf16.mxu1 %vm3456_vm0, %v3454_v4 }
 0x25d   :  { %2984 = vmatprep.subr.bf16.mxu1 %v3454_v4 }
 0x2c4   :  { %v532_v19 = vpop.permute.xlu1 %531 }
 0x2c5   :  { %v535_v17 = vpop.permute.xlu0 %534 }
 0x2c6   :  { %v540_v18 = vsel %vm407_vm1, %v535_v17, 0 }
 0x2c7   :  { %2979 = vmatpush3.bf16.xpose.msra.mxu0 %v540_v18 }
 0x2c8   :  { %2990 = vmatprep.subr.bf16.mxu0 %v3454_v4 }
 0x2ce   :  { %2981 = vmatmul.mubr.msk.bf16.vlgmr.msra.gmra.mrb[4].mxu0 %vm407_vm1, %v532_v19 }
 0x2cf   :  { %3006 = vmatprep.mubr.msk.bf16.mxu0 %vm3456_vm0, %v3454_v4 }
 0x32e   :  { %v448_v20 = vpop.f32.mrb[4].mxu1 }
 0x32f   :  { %v455_v22 = vmul.f32 0.125, %v448_v20  ;;  %v2970_v23 = vpop.f32.mrb[5].mxu1 }
 0x330   :  { %v451_v24 = vpop.f32.mrb[6].mxu1  ;;  %v3163_v23 = vld [vmem:[%s4101_s7 + $0x8] sm:$0xff]  }
 0x331   :  { %v456_v26 = vmul.f32 0.125, %v451_v24  ;;  %v2971_v27 = vpop.f32.mrb[7].mxu1  ;;  %v457_v28 = vadd.f32 %v455_v22, %v3674_v21  ;;  %v3162_v22 = vld [vmem:[%s4101_s7] sm:$0xff]   ;;  %v3164_v24 = vld [vmem:[%s4101_s7 + $0x10] sm:$0xff]  }
 0x332   :  { %2991 = vmatpush3.bf16.msra.mxu0 %v3162_v22 }
 0x333   :  { %v460_v29 = vsel %vm459_vm2, %v457_v28, -inf  ;;  %v458_v31 = vadd.f32 %v456_v26, %v3679_v25  ;;  %2992 = vmatprep.subr.bf16.mxu0 %v3454_v4 }
 0x334   :  { %461 = vmax.xlane.f32.xlu1 %v460_v29  ;;  %v3165_v29 = vld [vmem:[%s4101_s7 + $0x18] sm:$0xff]  }
 0x335   :  { %v463_v32 = vsel %vm459_vm2, %v458_v31, -inf }
 0x336   :  { %464 = vmax.xlane.f32.xlu0 %v463_v32  ;;  %2993 = vmatpush3.bf16.msra.mxu0 %v3163_v23  ;;  %v3166_v32 = vld [vmem:[%s4101_s7 + $0x20] sm:$0xff]  }
 0x337   :  { %2994 = vmatprep.subr.bf16.mxu0 %v3454_v4 }
 0x33a   :  { %2995 = vmatpush3.bf16.msra.mxu0 %v3164_v24 }
 0x33b   :  { %2996 = vmatprep.subr.bf16.mxu0 %v3454_v4 }
 0x33e   :  { %2997 = vmatpush3.bf16.msra.mxu0 %v3165_v29  ;;  %v2660_v29 = vld [vmem:[%s4103_s9] ss:$0 sm:$0xff] }
 0x33f   :  { %2998 = vmatprep.subr.bf16.mxu0 %v3454_v4 }
 0x342   :  { %2999 = vmatpush3.bf16.msra.mxu0 %v3166_v32 }
 0x343   :  { %3000 = vmatprep.subr.bf16.mxu0 %v3454_v4 }
 0x3a1   :  { %v576_v33 = vpop.f32.mrb[4].mxu0 }
 0x3a2   :  { %v583_v34 = vmul.f32 0.125, %v576_v33  ;;  %v2982_v35 = vpop.f32.mrb[5].mxu0  ;;  %v3167_v33 = vld [vmem:[%s4101_s7 + $0x28] sm:$0xff]  }
 0x3a3   :  { %v579_v36 = vpop.f32.mrb[6].mxu0  ;;  %3001 = vmatpush3.bf16.msra.mxu0 %v3167_v33  ;;  %v3169_v35 = vld [vmem:[%s4101_s7 + $0x38] sm:$0xff]  }
 0x3a4   :  { %v584_v37 = vmul.f32 0.125, %v579_v36  ;;  %v2983_v38 = vpop.f32.mrb[7].mxu0  ;;  %v585_v39 = vadd.f32 %v583_v34, %v3674_v21  ;;  %3002 = vmatprep.subr.bf16.mxu0 %v3454_v4  ;;  %v3168_v34 = vld [vmem:[%s4101_s7 + $0x30] sm:$0xff]  }
 0x3a6   :  { %v587_v40 = vsel %vm459_vm2, %v585_v39, -inf  ;;  %v586_v41 = vadd.f32 %v584_v37, %v3679_v25 }
 0x3a7   :  { %588 = vmax.xlane.f32.xlu0 %v587_v40  ;;  %3003 = vmatpush3.bf16.msra.mxu0 %v3168_v34  ;;  %v2661_v34 = vld [vmem:[%s4104_s10] ss:$0 sm:$0xff] }
 0x3a8   :  { %v590_v42 = vsel %vm459_vm2, %v586_v41, -inf  ;;  %3004 = vmatprep.subr.bf16.mxu0 %v3454_v4 }
 0x3a9   :  { %591 = vmax.xlane.f32.xlu1 %v590_v42 }
 0x3ab   :  { %3005 = vmatpush3.bf16.msra.mxu0 %v3169_v35 }
 0x3c1   :  { %v462_v43 = vpop.xlane.xlu1 %461 }
 0x3c2   :  { %v466_v44 = vsub.f32 %v457_v28, %v462_v43 }
 0x3c3   :  { %v465_v45 = vpop.xlane.xlu0 %464 }
 0x3c4   :  { %v468_v46 = vmul.f32 1.442695, %v466_v44  ;;  %v467_v47 = vsub.f32 %v458_v31, %v465_v45  ;;  %v2651_v45 = vld [vmem:[%s4102_s8] ss:$0 sm:$0xff] }
 0x3c6   :  { %3310 = vpow2.f32 %v468_v46  ;;  %v470_v48 = vmul.f32 1.442695, %v467_v47 }
 0x3c8   :  { %3312 = vpow2.f32 %v470_v48 }
 0x3d0   :  { %v3311_v49 = vpop.eup %3310 }
 0x3d1   :  { %v472_v52 = vsel %vm459_vm2, %v3311_v49, 0.0 }
 0x3d2   :  { %v3313_v53 = vpop.eup %3312  ;;  %473 = vadd.xlane.f32.xlu0 %v472_v52 }
 0x3d3   :  { %v475_v57 = vsel %vm459_vm2, %v3313_v53, 0.0 }
 0x3d4   :  { %476 = vadd.xlane.f32.xlu1 %v475_v57 }
 0x434   :  { %v589_v59 = vpop.xlane.xlu0 %588 }
 0x435   :  { %v593_v60 = vsub.f32 %v585_v39, %v589_v59 }
 0x436   :  { %v592_v61 = vpop.xlane.xlu1 %591 }
 0x437   :  { %v595_v62 = vmul.f32 1.442695, %v593_v60  ;;  %v594_v63 = vsub.f32 %v586_v41, %v592_v61  ;;  %v3170_v60 = vld [vmem:[%s4105_s11] ss:$8 sps:$4 sm:$0xff]   ;;  %v3172_v61 = vld [vmem:[%s4105_s11 + $0x4] ss:$8 sps:$4 sm:$0xff]  }
 0x439   :  { %3314 = vpow2.f32 %v595_v62  ;;  %v597_v0 = vmul.f32 1.442695, %v594_v63  ;;  %v3175_v62 = vld [vmem:[%s4105_s11 + $0x14] ss:$8 sps:$4 sm:$0xff]  }
 0x43b   :  { %3316 = vpow2.f32 %v597_v0 }
 0x443   :  { %v3315_v1 = vpop.eup %3314 }
 0x444   :  { %v599_v2 = vsel %vm459_vm2, %v3315_v1, 0.0 }
 0x445   :  { %v3317_v3 = vpop.eup %3316  ;;  %600 = vadd.xlane.f32.xlu0 %v599_v2 }
 0x446   :  { %v602_v5 = vsel %vm459_vm2, %v3317_v3, 0.0 }
 0x447   :  { %603 = vadd.xlane.f32.xlu1 %v602_v5 }
 0x45b   :  { %611 = vrot.lane.b32.xlu0 %v3655_v13, %s3452_s25 }
 0x45f   :  { %v474_v6 = vpop.xlane.xlu0 %473 }
 0x460   :  { %3318 = vrcp.f32 %v474_v6 }
 0x461   :  { %v477_v7 = vpop.xlane.xlu1 %476 }
 0x462   :  { %3320 = vrcp.f32 %v477_v7  ;;  %v3178_v7 = vld [vmem:[%s4105_s11 + $0x24] ss:$8 sps:$4 sm:$0xff]  }
 0x46a   :  { %v3319_v8 = vpop.eup %3318 }
 0x46b   :  { %v480_v10 = vmul.f32 %v3319_v8, %v3311_v49  ;;  %v3176_v8 = vld [vmem:[%s4105_s11 + $0x20] ss:$8 sps:$4 sm:$0xff]  }
 0x46c   :  { %v3321_v9 = vpop.eup %3320 }
 0x46d   :  { %v481_v11 = vmul.f32 %v3321_v9, %v3313_v53  ;;  %v3181_v9 = vld [vmem:[%s4105_s11 + $0x34] ss:$8 sps:$4 sm:$0xff]  }
 0x46f   :  { %v482_v12 = vpack.c.bf16 %v481_v11, %v480_v10  ;;  %v3179_v10 = vld [vmem:[%s4105_s11 + $0x30] ss:$8 sps:$4 sm:$0xff]   ;;  %v3184_v11 = vld [vmem:[%s4105_s11 + $0x44] ss:$8 sps:$4 sm:$0xff]  }
 0x471   :  { %2975 = vmatmul.mubr.msk.bf16.vlgmr.msra.gmra.mrb[8].mxu1 %vm459_vm2, %v482_v12  ;;  %v3182_v12 = vld [vmem:[%s4105_s11 + $0x40] ss:$8 sps:$4 sm:$0xff]  }
 0x472   :  { %2986 = vmatprep.mubr.msk.bf16.mxu1 %vm3456_vm0, %v3454_v4 }
 0x4d2   :  { %v601_v14 = vpop.xlane.xlu0 %600 }
 0x4d3   :  { %3322 = vrcp.f32 %v601_v14  ;;  %v3187_v14 = vld [vmem:[%s4105_s11 + $0x54] ss:$8 sps:$4 sm:$0xff]  }
 0x4d4   :  { %v604_v15 = vpop.xlane.xlu1 %603 }
 0x4d5   :  { %3324 = vrcp.f32 %v604_v15  ;;  %v3185_v15 = vld [vmem:[%s4105_s11 + $0x50] ss:$8 sps:$4 sm:$0xff]  }
 0x4d6   :  { %v612_v16 = vpop.permute.xlu0 %611 }
 0x4d7   :  { %2985 = vmatpush3.bf16.msra.mxu1 %v612_v16  ;;  %v3190_v16 = vld [vmem:[%s4105_s11 + $0x64] ss:$8 sps:$4 sm:$0xff]  }
 0x4d8   :  { %935 = vmatprep.subr.bf16.mxu1 %v3172_v61  ;;  %v843_v61 = vld [vmem:[%s4106_s12] sm:$0x3] }
 0x4dd   :  { %v3323_v13 = vpop.eup %3322 }
 0x4de   :  { %v607_v18 = vmul.f32 %v3323_v13, %v3315_v1  ;;  %v3188_v13 = vld [vmem:[%s4105_s11 + $0x60] ss:$8 sps:$4 sm:$0xff]  }
 0x4df   :  { %v3325_v17 = vpop.eup %3324 }
 0x4e0   :  { %v608_v19 = vmul.f32 %v3325_v17, %v3317_v3  ;;  %v3193_v17 = vld [vmem:[%s4105_s11 + $0x74] ss:$8 sps:$4 sm:$0xff]  }
 0x4e2   :  { %v609_v20 = vpack.c.bf16 %v608_v19, %v607_v18  ;;  %v3191_v18 = vld [vmem:[%s4105_s11 + $0x70] ss:$8 sps:$4 sm:$0xff]  }
 0x4e4   :  { %2987 = vmatmul.mubr.msk.bf16.vlgmr.msra.gmra.mrb[12].mxu1 %vm459_vm2, %v609_v20 }
 0x4e5   :  { %967 = vmatprep.mubr.bf16.mxu1 %v3455_v30  ;;  %936 = vmatpush1.bf16.msra.mxu1 %v3170_v60  ;;  %v3209_v60 = vld [vmem:[#allocation6 + $0x38] sm:$0xff]  }
 0x4e6   :  { %937 = vmatprep.subr.bf16.mxu1 %v3175_v62  ;;  %v848_v62 = vrot.slane %v843_v61, %v3642_v55 }
 0x544   :  { %v521_v26 = vpop.f32.mrb[8].mxu1 }
 0x545   :  { %528 = vst.msk [vmem:[#allocation2] sm:$0xff] %vm407_vm1, %v521_v26  ;;  %v2976_v27 = vpop.f32.mrb[9].mxu1 }
 0x546   :  { %v524_v28 = vpop.f32.mrb[10].mxu1 }
 0x547   :  { %529 = vst.msk [vmem:[#allocation2 + $0x8] sm:$0xff] %vm407_vm1, %v524_v28  ;;  %v2977_v31 = vpop.f32.mrb[11].mxu1 }
 0x5b7   :  { %v651_v36 = vpop.f32.mrb[12].mxu1 }
 0x5b8   :  { %660 = vrot.lane.b32.xlu1 %v651_v36, %s3452_s25  ;;  %v2988_v37 = vpop.f32.mrb[13].mxu1 }
 0x5b9   :  { %v654_v38 = vpop.f32.mrb[14].mxu1 }
 0x5ba   :  { %v2989_v39 = vpop.f32.mrb[15].mxu1 }
 0x5bb   :  { %v3194_v39 = vld [vmem:[#allocation6 + $0x40] sm:$0xff]  }
 0x5bc   :  { %662 = vrot.lane.b32.xlu1 %v654_v38, %s3452_s25  ;;  %2856 = vmatprep.subr.bf16.mxu0 %v3194_v39 }
 0x62a   :  { %v661_v40 = vpop.permute.xlu1 %660 }
 0x62b   :  { %667 = vst.msk [vmem:[#allocation2] sm:$0xff] %vm666_vm3, %v661_v40  ;;  %v3195_v40 = vld [vmem:[#allocation6] sm:$0xff]  }
 0x62e   :  { %v663_v41 = vpop.permute.xlu1 %662 }
 0x62f   :  { %668 = vst.msk [vmem:[#allocation2 + $0x8] sm:$0xff] %vm666_vm3, %v663_v41  ;;  %v3196_v41 = vld [vmem:[#allocation6 + $0x48] sm:$0xff]  }
 0x632   :  { %v669_v42 = vld [vmem:[#allocation2] sm:$0xff] }
 0x636   :  { %v670_v43 = vld [vmem:[#allocation2 + $0x8] sm:$0xff] }
 0x637   :  { %v687_v44 = vpack.c.bf16 %v670_v43, %v669_v42  ;;  %v3197_v42 = vld [vmem:[#allocation6 + $0x8] sm:$0xff]   ;;  %v3198_v43 = vld [vmem:[#allocation6 + $0x50] sm:$0xff]  }
 0x639   :  { %3007 = vmatmul.mubr.bf16.vlgmr.msra.gmra.mrb[8].mxu0 %v687_v44  ;;  %v3199_v44 = vld [vmem:[#allocation6 + $0x10] sm:$0xff]  }
 0x63a   :  { %2857 = vmatpush3.bf16.msra.mxu0 %v3195_v40 }
 0x63b   :  { %2858 = vmatprep.subr.bf16.mxu0 %v3196_v41 }
 0x63e   :  { %2859 = vmatpush3.bf16.msra.mxu0 %v3197_v42 }
 0x63f   :  { %2860 = vmatprep.subr.bf16.mxu0 %v3198_v43 }
 0x642   :  { %2861 = vmatpush3.bf16.msra.mxu0 %v3199_v44 }
 0x70c   :  { %v777_v46 = vpop.f32.mrb[8].mxu0 }
 0x70d   :  { %v778_v47 = vadd.f32 %v2651_v45, %v777_v46  ;;  %v3008_v48 = vpop.f32.mrb[9].mxu0  ;;  %v3201_v46 = vld [vmem:[#allocation6 + $0x18] sm:$0xff]  }
 0x70e   :  { %v780_v49 = vpop.f32.mrb[10].mxu0  ;;  %v3203_v48 = vld [vmem:[#allocation6 + $0x20] sm:$0xff]  }
 0x70f   :  { %v781_v52 = vadd.f32 %v2651_v45, %v780_v49  ;;  %v3009_v53 = vpop.f32.mrb[11].mxu0  ;;  %v784_v57 = vadd.f32 %v778_v47, %v3629_v50  ;;  %v3173_v50 = vld [vmem:[%s4105_s11 + $0x10] ss:$8 sps:$4 sm:$0xff]   ;;  %v3200_v45 = vld [vmem:[#allocation6 + $0x58] sm:$0xff]  }
 0x710   :  { %938 = vmatpush1.bf16.msra.mxu1 %v3173_v50  ;;  %2862 = vmatprep.subr.bf16.mxu0 %v3200_v45  ;;  %v3202_v47 = vld [vmem:[#allocation6 + $0x60] sm:$0xff]   ;;  %v3204_v49 = vld [vmem:[#allocation6 + $0x68] sm:$0xff]   ;;  %v3206_v53 = vld [vmem:[#allocation6 + $0x70] sm:$0xff]   ;;  %v852_v50 = vrot.slane %v843_v61, %v3649_v58 }
 0x711   :  { %788 = vadd.xlane.f32.xlu1 %v784_v57  ;;  %v785_v59 = vadd.f32 %v781_v52, %v3631_v51  ;;  %939 = vmatprep.subr.bf16.mxu1 %v3178_v7  ;;  %v3205_v52 = vld [vmem:[#allocation6 + $0x28] sm:$0xff]  }
 0x712   :  { %2863 = vmatpush3.bf16.msra.mxu0 %v3201_v46 }
 0x713   :  { %790 = vadd.xlane.f32.xlu0 %v785_v59  ;;  %2864 = vmatprep.subr.bf16.mxu0 %v3202_v47 }
 0x714   :  { %940 = vmatpush1.bf16.msra.mxu1 %v3176_v8 }
 0x715   :  { %941 = vmatprep.subr.bf16.mxu1 %v3181_v9 }
 0x716   :  { %2865 = vmatpush3.bf16.msra.mxu0 %v3203_v48 }
 0x717   :  { %2866 = vmatprep.subr.bf16.mxu0 %v3204_v49 }
 0x718   :  { %942 = vmatpush1.bf16.msra.mxu1 %v3179_v10 }
 0x719   :  { %943 = vmatprep.subr.bf16.mxu1 %v3184_v11 }
 0x71a   :  { %2867 = vmatpush3.bf16.msra.mxu0 %v3205_v52 }
 0x71b   :  { %2868 = vmatprep.subr.bf16.mxu0 %v3206_v53  ;;  %v2678_v53 = vld [vmem:[%s4108_s14] ss:$0 sm:$0xff] }
 0x71c   :  { %944 = vmatpush1.bf16.msra.mxu1 %v3182_v12 }
 0x71d   :  { %945 = vmatprep.subr.bf16.mxu1 %v3187_v14 }
 0x720   :  { %946 = vmatpush1.bf16.msra.mxu1 %v3185_v15 }
 0x721   :  { %947 = vmatprep.subr.bf16.mxu1 %v3190_v16 }
 0x724   :  { %948 = vmatpush1.bf16.msra.mxu1 %v3188_v13 }
 0x725   :  { %949 = vmatprep.subr.bf16.mxu1 %v3193_v17 }
 0x728   :  { %950 = vmatpush1.bf16.msra.mxu1 %v3191_v18 }
 0x79e   :  { %v789_v51 = vpop.xlane.xlu1 %788 }
 0x79f   :  { %v792_v63 = vmul.f32 0.0078125, %v789_v51 }
 0x7a0   :  { %v791_v0 = vpop.xlane.xlu0 %790 }
 0x7a1   :  { %v794_v1 = vsub.f32 %v784_v57, %v792_v63  ;;  %v793_v2 = vmul.f32 0.0078125, %v791_v0  ;;  %v3207_v57 = vld [vmem:[#allocation6 + $0x30] sm:$0xff]  }
 0x7a2   :  { %2869 = vmatpush3.bf16.msra.mxu0 %v3207_v57 }
 0x7a3   :  { %v795_v3 = vsub.f32 %v785_v59, %v793_v2  ;;  %v796_v5 = vmul.f32 %v794_v1, %v794_v1  ;;  %v3208_v59 = vld [vmem:[#allocation6 + $0x78] sm:$0xff]  }
 0x7a4   :  { %2870 = vmatprep.subr.bf16.mxu0 %v3208_v59 }
 0x7a5   :  { %798 = vadd.xlane.f32.xlu0 %v796_v5  ;;  %v797_v6 = vmul.f32 %v795_v3, %v795_v3 }
 0x7a6   :  { %2871 = vmatpush3.bf16.msra.mxu0 %v3209_v60 }
 0x7a7   :  { %3010 = vmatprep.subr.bf16.mxu0 %v3454_v4 }
 0x7a9   :  { %800 = vadd.xlane.f32.xlu0 %v797_v6 }
 0x832   :  { %v799_v19 = vpop.xlane.xlu0 %798 }
 0x833   :  { %v802_v20 = vmul.f32 0.0078125, %v799_v19 }
 0x835   :  { %v804_v22 = vadd.f32 1e-12, %v802_v20 }
 0x836   :  { %v801_v23 = vpop.xlane.xlu0 %800 }
 0x837   :  { %3326 = vrsqrt.f32 %v804_v22  ;;  %v803_v24 = vmul.f32 0.0078125, %v801_v23 }
 0x839   :  { %v805_v26 = vadd.f32 1e-12, %v803_v24 }
 0x83b   :  { %3328 = vrsqrt.f32 %v805_v26 }
 0x841   :  { %v3327_v27 = vpop.eup %3326 }
 0x842   :  { %v808_v28 = vmul.f32 %v3327_v27, %v794_v1 }
 0x844   :  { %v816_v33 = vmul.f32 %v2660_v29, %v808_v28 }
 0x845   :  { %v3329_v31 = vpop.eup %3328 }
 0x846   :  { %v809_v32 = vmul.f32 %v3329_v31, %v795_v3  ;;  %v3796_v36 = vadd.f32 %v2661_v34, %v816_v33 }
 0x848   :  { %v817_v35 = vmul.f32 %v2660_v29, %v809_v32 }
 0x84a   :  { %v3798_v37 = vadd.f32 %v2661_v34, %v817_v35 }
 0x84c   :  { %v842_v38 = vpack.c.bf16 %v3798_v37, %v3796_v36 }
 0x84e   :  { %968 = vmatmul.mubr.bf16.vlgmr.msra.gmra.mrb[16].mxu1 %v842_v38 }
 0x84f   :  { %1446 = vmatprep.mubr.bf16.mxu1 %v3455_v30 }
 0x921   :  { %v969_v51 = vpop.f32.mrb[16].mxu1 }
 0x922   :  { %v970_v63 = vadd.f32 %v969_v51, %v848_v62  ;;  %v971_v0 = vpop.f32.mrb[17].mxu1 }
 0x923   :  { %v972_v1 = vadd.f32 %v971_v0, %v852_v50  ;;  %v973_v2 = vpop.f32.mrb[18].mxu1 }
 0x924   :  { %v982_v3 = vmul.f32 0.044715, %v970_v63  ;;  %v974_v5 = vadd.f32 %v973_v2, %v848_v62  ;;  %v975_v6 = vpop.f32.mrb[19].mxu1  ;;  %v978_v38 = vmul.f32 0.5, %v970_v63  ;;  %v3212_v2 = vld [vmem:[#allocation3 + $0xc4] ss:$12 sps:$4 sm:$0xff]  }
 0x925   :  { %v983_v7 = vmul.f32 0.044715, %v972_v1  ;;  %v976_v8 = vadd.f32 %v975_v6, %v852_v50  ;;  %v979_v41 = vmul.f32 0.5, %v972_v1  ;;  %1414 = vmatprep.subr.bf16.mxu1 %v3212_v2  ;;  %v3217_v6 = vld [vmem:[#allocation3 + $0xe0] ss:$12 sps:$4 sm:$0xff]  }
 0x926   :  { %v986_v9 = vmul.f32 %v982_v3, %v970_v63  ;;  %v984_v10 = vmul.f32 0.044715, %v974_v5  ;;  %v980_v39 = vmul.f32 0.5, %v974_v5  ;;  %v3213_v3 = vld [vmem:[#allocation3 + $0xc8] ss:$12 sps:$4 sm:$0xff]  }
 0x927   :  { %v987_v11 = vmul.f32 %v983_v7, %v972_v1  ;;  %v985_v12 = vmul.f32 0.044715, %v976_v8  ;;  %v981_v42 = vmul.f32 0.5, %v976_v8  ;;  %v3214_v7 = vld [vmem:[#allocation3 + $0xd8] ss:$12 sps:$4 sm:$0xff]  }
 0x928   :  { %v990_v14 = vmul.f32 %v986_v9, %v970_v63  ;;  %v988_v15 = vmul.f32 %v984_v10, %v974_v5 }
 0x929   :  { %v991_v16 = vmul.f32 %v987_v11, %v972_v1  ;;  %v989_v13 = vmul.f32 %v985_v12, %v976_v8 }
 0x92a   :  { %v994_v17 = vadd.f32 %v990_v14, %v970_v63  ;;  %v992_v18 = vmul.f32 %v988_v15, %v974_v5  ;;  %v3220_v15 = vld [vmem:[#allocation3 + $0xf4] ss:$12 sps:$4 sm:$0xff]  }
 0x92b   :  { %v993_v19 = vmul.f32 %v989_v13, %v976_v8  ;;  %v995_v20 = vadd.f32 %v991_v16, %v972_v1  ;;  %v3210_v1 = vld [vmem:[#allocation3 + $0xc0] ss:$12 sps:$4 sm:$0xff]   ;;  %v3218_v16 = vld [vmem:[#allocation3 + $0xf0] ss:$12 sps:$4 sm:$0xff]   ;;  %v3221_v13 = vld [vmem:[#allocation3 + $0xf8] ss:$12 sps:$4 sm:$0xff]  }
 0x92c   :  { %v998_v22 = vmul.f32 0.7978846, %v994_v17  ;;  %v996_v23 = vadd.f32 %v992_v18, %v974_v5  ;;  %v3216_v5 = vld [vmem:[#allocation3 + $0xdc] ss:$12 sps:$4 sm:$0xff]   ;;  %1415 = vmatpush1.bf16.msra.mxu1 %v3210_v1  ;;  %v3224_v17 = vld [vmem:[#allocation3 + $0x10c] ss:$12 sps:$4 sm:$0xff]  }
 0x92d   :  { %v997_v24 = vadd.f32 %v993_v19, %v976_v8  ;;  %v999_v26 = vmul.f32 0.7978846, %v995_v20  ;;  %1416 = vmatprep.subr.bf16.mxu1 %v3216_v5  ;;  %v3222_v18 = vld [vmem:[#allocation3 + $0x108] ss:$12 sps:$4 sm:$0xff]   ;;  %v3225_v19 = vld [vmem:[#allocation3 + $0x110] ss:$12 sps:$4 sm:$0xff]  }
 0x92e   :  { %3330 = vtanh.f32 %v998_v22  ;;  %v1000_v27 = vmul.f32 0.7978846, %v996_v23  ;;  %v3228_v20 = vld [vmem:[#allocation3 + $0x124] ss:$12 sps:$4 sm:$0xff]   ;;  %v3226_v22 = vld [vmem:[#allocation3 + $0x120] ss:$12 sps:$4 sm:$0xff]  }
 0x92f   :  { %v1001_v28 = vmul.f32 0.7978846, %v997_v24  ;;  %3332 = vtanh.f32 %v999_v26  ;;  %v3229_v23 = vld [vmem:[#allocation3 + $0x128] ss:$12 sps:$4 sm:$0xff]   ;;  %v3230_v26 = vld [vmem:[#allocation3 + $0x138] ss:$12 sps:$4 sm:$0xff]  }
 0x930   :  { %3334 = vtanh.f32 %v1000_v27  ;;  %1417 = vmatpush1.bf16.msra.mxu1 %v3214_v7  ;;  %v3232_v24 = vld [vmem:[#allocation3 + $0x13c] ss:$12 sps:$4 sm:$0xff]   ;;  %v3233_v27 = vld [vmem:[#allocation3 + $0x140] ss:$12 sps:$4 sm:$0xff]  }
 0x931   :  { %3336 = vtanh.f32 %v1001_v28  ;;  %1418 = vmatprep.subr.bf16.mxu1 %v3220_v15  ;;  %v3236_v28 = vld [vmem:[#allocation3 + $0x154] ss:$12 sps:$4 sm:$0xff]  }
 0x934   :  { %1419 = vmatpush1.bf16.msra.mxu1 %v3218_v16 }
 0x935   :  { %1420 = vmatprep.subr.bf16.mxu1 %v3224_v17 }
 0x938   :  { %v3331_v29 = vpop.eup %3330  ;;  %1421 = vmatpush1.bf16.msra.mxu1 %v3222_v18 }
 0x939   :  { %v3333_v31 = vpop.eup %3332  ;;  %v1006_v32 = vadd.f32 1.0, %v3331_v29  ;;  %1422 = vmatprep.subr.bf16.mxu1 %v3228_v20  ;;  %v3234_v29 = vld [vmem:[#allocation3 + $0x150] ss:$12 sps:$4 sm:$0xff]  }
 0x93a   :  { %v3335_v33 = vpop.eup %3334  ;;  %v1007_v34 = vadd.f32 1.0, %v3333_v31  ;;  %v3237_v31 = vld [vmem:[#allocation3 + $0x158] ss:$12 sps:$4 sm:$0xff]  }
 0x93b   :  { %v3337_v35 = vpop.eup %3336  ;;  %v1008_v40 = vadd.f32 1.0, %v3335_v33  ;;  %v1010_v44 = vmul.f32 %v1006_v32, %v978_v38  ;;  %v3240_v32 = vld [vmem:[#allocation3 + $0x16c] ss:$12 sps:$4 sm:$0xff]   ;;  %v3238_v33 = vld [vmem:[#allocation3 + $0x168] ss:$12 sps:$4 sm:$0xff]  }
 0x93c   :  { %v1009_v43 = vadd.f32 1.0, %v3337_v35  ;;  %v1011_v46 = vmul.f32 %v1007_v34, %v979_v41  ;;  %1423 = vmatpush1.bf16.msra.mxu1 %v3226_v22  ;;  %v3241_v34 = vld [vmem:[#allocation3 + $0x170] ss:$12 sps:$4 sm:$0xff]  }
 0x93d   :  { %v1012_v45 = vmul.f32 %v1008_v40, %v980_v39  ;;  %1424 = vmatprep.subr.bf16.mxu1 %v3232_v24 }
 0x93e   :  { %v1013_v47 = vmul.f32 %v1009_v43, %v981_v42 }
 0x93f   :  { %v1046_v48 = vpack.c.bf16 %v1012_v45, %v1010_v44  ;;  %v2695_v44 = vld [vmem:[%s4109_s15] ss:$0 sm:$0xff] }
 0x940   :  { %v1047_v49 = vpack.c.bf16 %v1013_v47, %v1011_v46  ;;  %1425 = vmatpush1.bf16.msra.mxu1 %v3230_v26 }
 0x941   :  { %1426 = vmatprep.subr.bf16.mxu1 %v3236_v28 }
 0x942   :  { %1183 = vmatprep.mubr.bf16.mxu0 %v1047_v49  ;;  %v2696_v49 = vld [vmem:[%s4110_s16] ss:$0 sm:$0xff] }
 0x943   :  { %1184 = vmatmul.mubr.bf16.vlgmr.msra.gmra.mrb[12].mxu0 %v1046_v48 }
 0x944   :  { %3026 = vmatprep.mubr.msk.bf16.mxu0 %vm3456_vm0, %v3454_v4  ;;  %3011 = vmatpush3.bf16.msra.mxu0 %v3213_v3 }
 0x945   :  { %3012 = vmatprep.subr.bf16.mxu0 %v3454_v4  ;;  %1427 = vmatpush1.bf16.msra.mxu1 %v3234_v29 }
 0x946   :  { %1428 = vmatprep.subr.bf16.mxu1 %v3240_v32 }
 0x948   :  { %3013 = vmatpush3.bf16.msra.mxu0 %v3217_v6 }
 0x949   :  { %3014 = vmatprep.subr.bf16.mxu0 %v3454_v4  ;;  %1429 = vmatpush1.bf16.msra.mxu1 %v3238_v33 }
 0x94a   :  { %3030 = vmatprep.subr.bf16.mxu1 %v3454_v4 }
 0x94c   :  { %3015 = vmatpush3.bf16.msra.mxu0 %v3221_v13 }
 0x94d   :  { %3016 = vmatprep.subr.bf16.mxu0 %v3454_v4 }
 0x950   :  { %3017 = vmatpush3.bf16.msra.mxu0 %v3225_v19 }
 0x951   :  { %3018 = vmatprep.subr.bf16.mxu0 %v3454_v4 }
 0x954   :  { %3019 = vmatpush3.bf16.msra.mxu0 %v3229_v23 }
 0x955   :  { %3020 = vmatprep.subr.bf16.mxu0 %v3454_v4 }
 0x958   :  { %3021 = vmatpush3.bf16.msra.mxu0 %v3233_v27 }
 0x959   :  { %3022 = vmatprep.subr.bf16.mxu0 %v3454_v4 }
 0x95c   :  { %3023 = vmatpush3.bf16.msra.mxu0 %v3237_v31 }
 0x95d   :  { %3024 = vmatprep.subr.bf16.mxu0 %v3454_v4 }
 0x960   :  { %3025 = vmatpush3.bf16.msra.mxu0 %v3241_v34 }
 0x961   :  { %3054 = vmatprep.subr.bf16.mxu0 %v3454_v4 }
 0xa16   :  { %v2872_v52 = vpop.f32.mrb[12].mxu0 }
 0xa17   :  { %v2873_v57 = vpop.f32.mrb[13].mxu0 }
 0xa18   :  { %v2874_v59 = vadd.f32 %v2873_v57, %v2872_v52  ;;  %v2875_v60 = vpop.f32.mrb[14].mxu0 }
 0xa19   :  { %v2876_v61 = vpop.f32.mrb[15].mxu0 }
 0xa1a   :  { %v1186_v62 = vadd.f32 %v2874_v59, %v2678_v53  ;;  %v2877_v50 = vadd.f32 %v2876_v61, %v2875_v60  ;;  %v2697_v60 = vld [vmem:[%s4100_s6 + $0x3] sm:$0x7]  ;;  %s4132_s6 = sld [smem:[#allocation14_spill]] }
 0xa1b   :  { %v1274_v61 = vrot.slane %v2697_v60, %v3642_v55 }
 0xa1c   :  { %v1189_v51 = vadd.f32 %v2877_v50, %v2678_v53  ;;  %v1192_v63 = vadd.f32 %v1186_v62, %v3796_v36  ;;  %v1282_v62 = vrot.slane %v2697_v60, %v188_v56 }
 0xa1e   :  { %1196 = vadd.xlane.f32.xlu1 %v1192_v63  ;;  %v1193_v0 = vadd.f32 %v1189_v51, %v3798_v37 }
 0xa20   :  { %1198 = vadd.xlane.f32.xlu0 %v1193_v0 }
 0xaab   :  { %v1197_v36 = vpop.xlane.xlu1 %1196 }
 0xaac   :  { %v1200_v8 = vmul.f32 0.0078125, %v1197_v36 }
 0xaad   :  { %v1199_v37 = vpop.xlane.xlu0 %1198 }
 0xaae   :  { %v1202_v9 = vsub.f32 %v1192_v63, %v1200_v8  ;;  %v1201_v10 = vmul.f32 0.0078125, %v1199_v37  ;;  %v1278_v63 = vrot.slane %v2697_v60, %v3649_v58 }
 0xab0   :  { %v1203_v11 = vsub.f32 %v1193_v0, %v1201_v10  ;;  %v1204_v12 = vmul.f32 %v1202_v9, %v1202_v9 }
 0xab2   :  { %1206 = vadd.xlane.f32.xlu1 %v1204_v12  ;;  %v1205_v14 = vmul.f32 %v1203_v11, %v1203_v11 }
 0xab4   :  { %1208 = vadd.xlane.f32.xlu0 %v1205_v14 }
 0xb3f   :  { %v1207_v35 = vpop.xlane.xlu1 %1206 }
 0xb40   :  { %v1210_v38 = vmul.f32 0.0078125, %v1207_v35 }
 0xb41   :  { %v1209_v39 = vpop.xlane.xlu0 %1208 }
 0xb42   :  { %v1212_v40 = vadd.f32 1e-12, %v1210_v38  ;;  %v1211_v41 = vmul.f32 0.0078125, %v1209_v39 }
 0xb44   :  { %3338 = vrsqrt.f32 %v1212_v40  ;;  %v1213_v42 = vadd.f32 1e-12, %v1211_v41 }
 0xb46   :  { %3340 = vrsqrt.f32 %v1213_v42 }
 0xb4e   :  { %v3339_v43 = vpop.eup %3338 }
 0xb4f   :  { %v1216_v45 = vmul.f32 %v3339_v43, %v1202_v9 }
 0xb50   :  { %v3341_v46 = vpop.eup %3340 }
 0xb51   :  { %v1217_v47 = vmul.f32 %v3341_v46, %v1203_v11  ;;  %v1224_v48 = vmul.f32 %v2695_v44, %v1216_v45 }
 0xb53   :  { %v1225_v52 = vmul.f32 %v2695_v44, %v1217_v47  ;;  %v3831_v53 = vadd.f32 %v2696_v49, %v1224_v48 }
 0xb55   :  { %v3833_v57 = vadd.f32 %v2696_v49, %v1225_v52 }
 0xb57   :  { %v1267_v59 = vpack.c.bf16 %v3833_v57, %v3831_v53 }
 0xb59   :  { %1447 = vmatmul.mubr.bf16.vlgmr.msra.gmra.mrb[20].mxu1 %v1267_v59  ;;  %3027 = vmatmul.mubr.bf16.vlgmr.msra.gmra.mrb[16].mxu0 %v1267_v59 }
 0xb5a   :  { %3032 = vmatprep.mubr.msk.bf16.mxu1 %vm3456_vm0, %v3454_v4  ;;  %3070 = vmatprep.mubr.msk.bf16.mxu0 %vm3456_vm0, %v3454_v4 }
 0xc2c   :  { %v1448_v50 = vpop.f32.mrb[20].mxu1  ;;  %v1491_v51 = vpop.f32.mrb[16].mxu0 }
 0xc2d   :  { %v1450_v0 = vpop.f32.mrb[21].mxu1  ;;  %v3028_v1 = vpop.f32.mrb[17].mxu0  ;;  %v1449_v5 = vadd.f32 %v1448_v50, %v1274_v61  ;;  %v1492_v6 = vadd.f32 %v1491_v51, %v1282_v62 }
 0xc2e   :  { %v1452_v2 = vpop.f32.mrb[22].mxu1  ;;  %v1494_v3 = vpop.f32.mrb[18].mxu0  ;;  %v1451_v9 = vadd.f32 %v1450_v0, %v1278_v63 }
 0xc2f   :  { %v1453_v7 = vadd.f32 %v1452_v2, %v1274_v61  ;;  %v1495_v36 = vadd.f32 %v1494_v3, %v1282_v62  ;;  %v1454_v8 = vpop.f32.mrb[23].mxu1  ;;  %v3029_v37 = vpop.f32.mrb[19].mxu0 }
 0xc30   :  { %v1455_v10 = vadd.f32 %v1454_v8, %v1278_v63 }
 0xc31   :  { %v1498_v11 = vpack.c.bf16 %v1453_v7, %v1449_v5  ;;  %v3848_v12 = vpack.c.bf16 %v1495_v36, %v1492_v6 }
 0xc32   :  { %v1499_v54 = vpack.c.bf16 %v1455_v10, %v1451_v9 }
 0xc34   :  { %v1504_v56 = vsel %vm407_vm1, %v1499_v54, 0 }
 0xc35   :  { %3031 = vmatpush3.bf16.xpose.msra.mxu1 %v1504_v56 }
 0xc36   :  { %3036 = vmatprep.subr.bf16.mxu1 %v3454_v4 }
 0xc3c   :  { %3033 = vmatmul.mubr.msk.bf16.vlgmr.msra.gmra.mrb[24].mxu1 %vm407_vm1, %v1498_v11 }
 0xc3d   :  { %3037 = vmatpush3.bf16.msra.mxu1 %v3848_v12  ;;  %3038 = vmatprep.mubr.msk.bf16.mxu1 %vm3456_vm0, %v3454_v4 }
 0xc3e   :  { %3042 = vmatprep.subr.bf16.mxu1 %v3454_v4 }
 0xd0f   :  { %v1540_v14 = vpop.f32.mrb[24].mxu1 }
 0xd10   :  { %v1547_v15 = vmul.f32 0.125, %v1540_v14  ;;  %v3034_v16 = vpop.f32.mrb[25].mxu1 }
 0xd11   :  { %v1543_v13 = vpop.f32.mrb[26].mxu1 }
 0xd12   :  { %v1548_v17 = vmul.f32 0.125, %v1543_v13  ;;  %v3035_v18 = vpop.f32.mrb[27].mxu1  ;;  %v1549_v19 = vadd.f32 %v1547_v15, %v3674_v21 }
 0xd13   :  { %v3242_v18 = vld [vmem:[%s4101_s7 + $0x40] sm:$0xff]  }
 0xd14   :  { %v1551_v20 = vsel %vm459_vm2, %v1549_v19, -inf  ;;  %v1550_v22 = vadd.f32 %v1548_v17, %v3679_v25  ;;  %3055 = vmatpush3.bf16.msra.mxu0 %v3242_v18 }
 0xd15   :  { %1552 = vmax.xlane.f32.xlu1 %v1551_v20  ;;  %3056 = vmatprep.subr.bf16.mxu0 %v3454_v4  ;;  %v3246_v20 = vld [vmem:[%s4101_s7 + $0x60] sm:$0xff]  }
 0xd16   :  { %v1554_v23 = vsel %vm459_vm2, %v1550_v22, -inf }
 0xd17   :  { %1555 = vmax.xlane.f32.xlu0 %v1554_v23  ;;  %v3248_v23 = vld [vmem:[%s4101_s7 + $0x70] sm:$0xff]  }
 0xda2   :  { %v1553_v24 = vpop.xlane.xlu1 %1552 }
 0xda3   :  { %v1557_v26 = vsub.f32 %v1549_v19, %v1553_v24  ;;  %v3244_v19 = vld [vmem:[%s4101_s7 + $0x50] sm:$0xff]   ;;  %v3249_v24 = vld [vmem:[%s4101_s7 + $0x78] sm:$0xff]  }
 0xda4   :  { %v1556_v27 = vpop.xlane.xlu0 %1555 }
 0xda5   :  { %v1559_v28 = vmul.f32 1.442695, %v1557_v26  ;;  %v1558_v29 = vsub.f32 %v1550_v22, %v1556_v27  ;;  %v3247_v22 = vld [vmem:[%s4101_s7 + $0x68] sm:$0xff]  }
 0xda7   :  { %3342 = vpow2.f32 %v1559_v28  ;;  %v1561_v31 = vmul.f32 1.442695, %v1558_v29 }
 0xda9   :  { %3344 = vpow2.f32 %v1561_v31 }
 0xdb1   :  { %v3343_v32 = vpop.eup %3342 }
 0xdb2   :  { %v1563_v33 = vsel %vm459_vm2, %v3343_v32, 0.0 }
 0xdb3   :  { %v3345_v34 = vpop.eup %3344  ;;  %1564 = vadd.xlane.f32.xlu1 %v1563_v33 }
 0xdb4   :  { %v1566_v35 = vsel %vm459_vm2, %v3345_v34, 0.0 }
 0xdb5   :  { %1567 = vadd.xlane.f32.xlu0 %v1566_v35 }
 0xdc4   :  { %1625 = vrot.lane.b32.xlu1 %v1499_v54, %s3452_s25 }
 0xdcb   :  { %1622 = vrot.lane.b32.xlu0 %v1498_v11, %s3452_s25 }
 0xe40   :  { %v1565_v38 = vpop.xlane.xlu1 %1564 }
 0xe41   :  { %3346 = vrcp.f32 %v1565_v38  ;;  %v2743_v38 = vld [vmem:[%s4102_s8 + $0x1] ss:$0 sm:$0xff] }
 0xe42   :  { %v1568_v39 = vpop.xlane.xlu0 %1567 }
 0xe43   :  { %3348 = vrcp.f32 %v1568_v39 }
 0xe44   :  { %v1626_v44 = vpop.permute.xlu1 %1625 }
 0xe45   :  { %v1631_v46 = vsel %vm407_vm1, %v1626_v44, 0 }
 0xe46   :  { %v1623_v47 = vpop.permute.xlu0 %1622 }
 0xe4b   :  { %v3347_v40 = vpop.eup %3346 }
 0xe4c   :  { %v1571_v42 = vmul.f32 %v3347_v40, %v3343_v32 }
 0xe4d   :  { %v3349_v41 = vpop.eup %3348 }
 0xe4e   :  { %v1572_v43 = vmul.f32 %v3349_v41, %v3345_v34 }
 0xe50   :  { %v1573_v45 = vpack.c.bf16 %v1572_v43, %v1571_v42 }
 0xe52   :  { %3039 = vmatmul.mubr.msk.bf16.vlgmr.msra.gmra.mrb[28].mxu1 %vm459_vm2, %v1573_v45 }
 0xe53   :  { %3043 = vmatpush3.bf16.xpose.msra.mxu1 %v1631_v46  ;;  %3044 = vmatprep.mubr.msk.bf16.mxu1 %vm3456_vm0, %v3454_v4 }
 0xe54   :  { %3048 = vmatprep.subr.bf16.mxu1 %v3454_v4 }
 0xe5a   :  { %3045 = vmatmul.mubr.msk.bf16.vlgmr.msra.gmra.mrb[32].mxu1 %vm407_vm1, %v1623_v47  ;;  %v3250_v47 = vld [vmem:[%s4105_s11 + $0x80] ss:$8 sps:$4 sm:$0xff]  }
 0xe5b   :  { %3050 = vmatprep.mubr.msk.bf16.mxu1 %vm3456_vm0, %v3454_v4 }
 0xf25   :  { %v1612_v48 = vpop.f32.mrb[28].mxu1 }
 0xf26   :  { %1619 = vst.msk [vmem:[#allocation2] sm:$0xff] %vm407_vm1, %v1612_v48  ;;  %v3040_v49 = vpop.f32.mrb[29].mxu1  ;;  %v3252_v48 = vld [vmem:[%s4105_s11 + $0x84] ss:$8 sps:$4 sm:$0xff]  }
 0xf27   :  { %v1615_v52 = vpop.f32.mrb[30].mxu1  ;;  %v3255_v49 = vld [vmem:[%s4105_s11 + $0x94] ss:$8 sps:$4 sm:$0xff]  }
 0xf28   :  { %1620 = vst.msk [vmem:[#allocation2 + $0x8] sm:$0xff] %vm407_vm1, %v1615_v52  ;;  %v3041_v59 = vpop.f32.mrb[31].mxu1 }
 0xf2d   :  { %v1667_v60 = vpop.f32.mrb[32].mxu1 }
 0xf2e   :  { %v1674_v61 = vmul.f32 0.125, %v1667_v60  ;;  %v3046_v62 = vpop.f32.mrb[33].mxu1 }
 0xf2f   :  { %v1670_v50 = vpop.f32.mrb[34].mxu1 }
 0xf30   :  { %v1675_v51 = vmul.f32 0.125, %v1670_v50  ;;  %v3047_v63 = vpop.f32.mrb[35].mxu1  ;;  %v1676_v0 = vadd.f32 %v1674_v61, %v3674_v21 }
 0xf31   :  { %v3258_v63 = vld [vmem:[%s4105_s11 + $0xa4] ss:$8 sps:$4 sm:$0xff]  }
 0xf32   :  { %v1678_v1 = vsel %vm459_vm2, %v1676_v0, -inf  ;;  %v1677_v2 = vadd.f32 %v1675_v51, %v3679_v25 }
 0xf33   :  { %1679 = vmax.xlane.f32.xlu1 %v1678_v1  ;;  %v3261_v1 = vld [vmem:[%s4105_s11 + $0xb4] ss:$8 sps:$4 sm:$0xff]  }
 0xf34   :  { %v1681_v3 = vsel %vm459_vm2, %v1677_v2, -inf }
 0xf35   :  { %1682 = vmax.xlane.f32.xlu0 %v1681_v3  ;;  %v3264_v3 = vld [vmem:[%s4105_s11 + $0xc4] ss:$8 sps:$4 sm:$0xff]  }
 0xfc0   :  { %v1680_v5 = vpop.xlane.xlu1 %1679 }
 0xfc1   :  { %v1684_v6 = vsub.f32 %v1676_v0, %v1680_v5  ;;  %v3256_v0 = vld [vmem:[%s4105_s11 + $0xa0] ss:$8 sps:$4 sm:$0xff]  }
 0xfc2   :  { %v1683_v7 = vpop.xlane.xlu0 %1682  ;;  %v3262_v5 = vld [vmem:[%s4105_s11 + $0xc0] ss:$8 sps:$4 sm:$0xff]  }
 0xfc3   :  { %v1686_v36 = vmul.f32 1.442695, %v1684_v6  ;;  %v1685_v8 = vsub.f32 %v1677_v2, %v1683_v7  ;;  %v3259_v2 = vld [vmem:[%s4105_s11 + $0xb0] ss:$8 sps:$4 sm:$0xff]   ;;  %v3267_v6 = vld [vmem:[%s4105_s11 + $0xd4] ss:$8 sps:$4 sm:$0xff]  }
 0xfc4   :  { %v3265_v7 = vld [vmem:[%s4105_s11 + $0xd0] ss:$8 sps:$4 sm:$0xff]  }
 0xfc5   :  { %3350 = vpow2.f32 %v1686_v36  ;;  %v1688_v37 = vmul.f32 1.442695, %v1685_v8  ;;  %v3270_v36 = vld [vmem:[%s4105_s11 + $0xe4] ss:$8 sps:$4 sm:$0xff]   ;;  %v3268_v8 = vld [vmem:[%s4105_s11 + $0xe0] ss:$8 sps:$4 sm:$0xff]  }
 0xfc7   :  { %3352 = vpow2.f32 %v1688_v37  ;;  %v3273_v37 = vld [vmem:[%s4105_s11 + $0xf4] ss:$8 sps:$4 sm:$0xff]  }
 0xfcf   :  { %v3351_v9 = vpop.eup %3350 }
 0xfd0   :  { %v1690_v10 = vsel %vm459_vm2, %v3351_v9, 0.0 }
 0xfd1   :  { %v3353_v21 = vpop.eup %3352  ;;  %1691 = vadd.xlane.f32.xlu1 %v1690_v10 }
 0xfd2   :  { %v1693_v11 = vsel %vm459_vm2, %v3353_v21, 0.0 }
 0xfd3   :  { %1694 = vadd.xlane.f32.xlu0 %v1693_v11 }
 0xfe2   :  { %1702 = vrot.lane.b32.xlu1 %v3848_v12, %s3452_s25  ;;  %v3243_v12 = vld [vmem:[%s4101_s7 + $0x48] sm:$0xff]  }
 0xfe3   :  { %3057 = vmatpush3.bf16.msra.mxu0 %v3243_v12  ;;  %v2755_v12 = vld [vmem:[%s4104_s10 + $0x1] ss:$0 sm:$0xff] }
 0xfe4   :  { %3058 = vmatprep.subr.bf16.mxu0 %v3454_v4 }
 0xfe7   :  { %3059 = vmatpush3.bf16.msra.mxu0 %v3244_v19 }
 0xfe8   :  { %3060 = vmatprep.subr.bf16.mxu0 %v3454_v4 }
0x105e   :  { %v1692_v25 = vpop.xlane.xlu1 %1691 }
0x105f   :  { %3354 = vrcp.f32 %v1692_v25 }
0x1060   :  { %v1695_v54 = vpop.xlane.xlu0 %1694 }
0x1061   :  { %3356 = vrcp.f32 %v1695_v54 }
0x1062   :  { %v1703_v56 = vpop.permute.xlu1 %1702 }
0x1063   :  { %3049 = vmatpush3.bf16.msra.mxu1 %v1703_v56 }
0x1064   :  { %2031 = vmatprep.subr.bf16.mxu1 %v3252_v48 }
0x1069   :  { %v3355_v14 = vpop.eup %3354 }
0x106a   :  { %v1698_v16 = vmul.f32 %v3355_v14, %v3351_v9  ;;  %v3271_v9 = vld [vmem:[%s4105_s11 + $0xf0] ss:$8 sps:$4 sm:$0xff]  }
0x106b   :  { %v3357_v15 = vpop.eup %3356 }
0x106c   :  { %v1699_v13 = vmul.f32 %v3357_v15, %v3353_v21  ;;  %v2754_v15 = vld [vmem:[%s4103_s9 + $0x1] ss:$0 sm:$0xff] }
0x106e   :  { %v1700_v17 = vpack.c.bf16 %v1699_v13, %v1698_v16 }
0x1070   :  { %3051 = vmatmul.mubr.msk.bf16.vlgmr.msra.gmra.mrb[36].mxu1 %vm459_vm2, %v1700_v17 }
0x1071   :  { %2063 = vmatprep.mubr.bf16.mxu1 %v3455_v30  ;;  %v3245_v30 = vld [vmem:[%s4101_s7 + $0x58] sm:$0xff]   ;;  %2032 = vmatpush1.bf16.msra.mxu1 %v3250_v47 }
0x1072   :  { %3061 = vmatpush3.bf16.msra.mxu0 %v3245_v30  ;;  %2033 = vmatprep.subr.bf16.mxu1 %v3255_v49 }
0x1073   :  { %3062 = vmatprep.subr.bf16.mxu0 %v3454_v4 }
0x1076   :  { %3063 = vmatpush3.bf16.msra.mxu0 %v3246_v20 }
0x1077   :  { %3064 = vmatprep.subr.bf16.mxu0 %v3454_v4 }
0x107a   :  { %3065 = vmatpush3.bf16.msra.mxu0 %v3247_v22 }
0x107b   :  { %3066 = vmatprep.subr.bf16.mxu0 %v3454_v4 }
0x107e   :  { %3067 = vmatpush3.bf16.msra.mxu0 %v3248_v23  ;;  %v3274_v23 = vld [vmem:[#allocation6 + $0xc0] sm:$0xff]  }
0x107f   :  { %3068 = vmatprep.subr.bf16.mxu0 %v3454_v4 }
0x1082   :  { %3069 = vmatpush3.bf16.msra.mxu0 %v3249_v24  ;;  %v3275_v24 = vld [vmem:[#allocation6 + $0x80] sm:$0xff]  }
0x1083   :  { %2904 = vmatprep.subr.bf16.mxu0 %v3274_v23 }
0x1143   :  { %v1742_v26 = vpop.f32.mrb[36].mxu1 }
0x1144   :  { %1751 = vrot.lane.b32.xlu0 %v1742_v26, %s3452_s25  ;;  %v3052_v27 = vpop.f32.mrb[37].mxu1  ;;  %v3276_v26 = vld [vmem:[#allocation6 + $0xc8] sm:$0xff]  }
0x1145   :  { %v1745_v28 = vpop.f32.mrb[38].mxu1  ;;  %v3277_v27 = vld [vmem:[#allocation6 + $0x88] sm:$0xff]  }
0x1146   :  { %1753 = vrot.lane.b32.xlu1 %v1745_v28, %s3452_s25  ;;  %v3053_v29 = vpop.f32.mrb[39].mxu1  ;;  %v3278_v28 = vld [vmem:[#allocation6 + $0xd0] sm:$0xff]  }
0x1147   :  { %v3279_v29 = vld [vmem:[#allocation6 + $0x90] sm:$0xff]  }
0x11b6   :  { %v1752_v31 = vpop.permute.xlu0 %1751 }
0x11b7   :  { %1757 = vst.msk [vmem:[#allocation2] sm:$0xff] %vm666_vm3, %v1752_v31  ;;  %v3280_v31 = vld [vmem:[#allocation6 + $0xd8] sm:$0xff]  }
0x11b8   :  { %v1754_v32 = vpop.permute.xlu1 %1753 }
0x11b9   :  { %1758 = vst.msk [vmem:[#allocation2 + $0x8] sm:$0xff] %vm666_vm3, %v1754_v32  ;;  %v3281_v32 = vld [vmem:[#allocation6 + $0x98] sm:$0xff]  }
0x11be   :  { %v1759_v33 = vld [vmem:[#allocation2] sm:$0xff] }
0x11c0   :  { %v1760_v34 = vld [vmem:[#allocation2 + $0x8] sm:$0xff] }
0x11c1   :  { %v1778_v35 = vpack.c.bf16 %v1760_v34, %v1759_v33  ;;  %v3282_v33 = vld [vmem:[#allocation6 + $0xe0] sm:$0xff]  }
0x11c2   :  { %v3283_v34 = vld [vmem:[#allocation6 + $0xa0] sm:$0xff]  }
0x11c3   :  { %3071 = vmatmul.mubr.bf16.vlgmr.msra.gmra.mrb[20].mxu0 %v1778_v35  ;;  %v3284_v35 = vld [vmem:[#allocation6 + $0xe8] sm:$0xff]  }
0x11c4   :  { %2905 = vmatpush3.bf16.msra.mxu0 %v3275_v24 }
0x11c5   :  { %2906 = vmatprep.subr.bf16.mxu0 %v3276_v26 }
0x11c8   :  { %2907 = vmatpush3.bf16.msra.mxu0 %v3277_v27 }
0x11c9   :  { %2908 = vmatprep.subr.bf16.mxu0 %v3278_v28 }
0x11cc   :  { %2909 = vmatpush3.bf16.msra.mxu0 %v3279_v29  ;;  %v2790_v29 = vld [vmem:[%s4108_s14 + $0x1] ss:$0 sm:$0xff] }
0x11cd   :  { %2910 = vmatprep.subr.bf16.mxu0 %v3280_v31 }
0x11d0   :  { %2911 = vmatpush3.bf16.msra.mxu0 %v3281_v32 }
0x11d1   :  { %2912 = vmatprep.subr.bf16.mxu0 %v3282_v33 }
0x11d4   :  { %2913 = vmatpush3.bf16.msra.mxu0 %v3283_v34 }
0x11d5   :  { %2914 = vmatprep.subr.bf16.mxu0 %v3284_v35 }
0x1296   :  { %v1869_v39 = vpop.f32.mrb[20].mxu0 }
0x1297   :  { %v1870_v40 = vadd.f32 %v2743_v38, %v1869_v39  ;;  %v3072_v41 = vpop.f32.mrb[21].mxu0  ;;  %v3286_v39 = vld [vmem:[#allocation6 + $0xf0] sm:$0xff]  }
0x1298   :  { %v1872_v42 = vpop.f32.mrb[22].mxu0  ;;  %v3288_v41 = vld [vmem:[#allocation6 + $0xf8] sm:$0xff]  }
0x1299   :  { %v1873_v43 = vadd.f32 %v2743_v38, %v1872_v42  ;;  %v3073_v44 = vpop.f32.mrb[23].mxu0  ;;  %v1876_v45 = vadd.f32 %v1870_v40, %v3831_v53  ;;  %v3253_v53 = vld [vmem:[%s4105_s11 + $0x90] ss:$8 sps:$4 sm:$0xff]   ;;  %v3287_v40 = vld [vmem:[#allocation6 + $0xb0] sm:$0xff]   ;;  %v3289_v42 = vld [vmem:[#allocation6 + $0xb8] sm:$0xff]  }
0x129a   :  { %2034 = vmatpush1.bf16.msra.mxu1 %v3253_v53  ;;  %v3285_v38 = vld [vmem:[#allocation6 + $0xa8] sm:$0xff]  }
0x129b   :  { %1882 = vadd.xlane.f32.xlu1 %v1876_v45  ;;  %v1877_v46 = vadd.f32 %v1873_v43, %v3833_v57  ;;  %2035 = vmatprep.subr.bf16.mxu1 %v3258_v63  ;;  %v2772_v43 = vld [vmem:[%s4106_s12 + $0x2] sm:$0x3] }
0x129c   :  { %2915 = vmatpush3.bf16.msra.mxu0 %v3285_v38  ;;  %v1944_v44 = vrot.slane %v2772_v43, %v3642_v55 }
0x129d   :  { %1884 = vadd.xlane.f32.xlu0 %v1877_v46  ;;  %2916 = vmatprep.subr.bf16.mxu0 %v3286_v39 }
0x129e   :  { %2036 = vmatpush1.bf16.msra.mxu1 %v3256_v0 }
0x129f   :  { %2037 = vmatprep.subr.bf16.mxu1 %v3261_v1 }
0x12a0   :  { %2917 = vmatpush3.bf16.msra.mxu0 %v3287_v40 }
0x12a1   :  { %2918 = vmatprep.subr.bf16.mxu0 %v3288_v41 }
0x12a2   :  { %2038 = vmatpush1.bf16.msra.mxu1 %v3259_v2 }
0x12a3   :  { %2039 = vmatprep.subr.bf16.mxu1 %v3264_v3 }
0x12a4   :  { %2919 = vmatpush3.bf16.msra.mxu0 %v3289_v42 }
0x12a5   :  { %3100 = vmatprep.subr.bf16.mxu0 %v3454_v4 }
0x12a6   :  { %2040 = vmatpush1.bf16.msra.mxu1 %v3262_v5 }
0x12a7   :  { %2041 = vmatprep.subr.bf16.mxu1 %v3267_v6 }
0x12aa   :  { %2042 = vmatpush1.bf16.msra.mxu1 %v3265_v7 }
0x12ab   :  { %2043 = vmatprep.subr.bf16.mxu1 %v3270_v36 }
0x12ae   :  { %2044 = vmatpush1.bf16.msra.mxu1 %v3268_v8 }
0x12af   :  { %2045 = vmatprep.subr.bf16.mxu1 %v3273_v37 }
0x12b2   :  { %2046 = vmatpush1.bf16.msra.mxu1 %v3271_v9 }
0x12b3   :  { %3074 = vmatprep.subr.bf16.mxu1 %v3454_v4 }
0x1328   :  { %v1883_v57 = vpop.xlane.xlu1 %1882 }
0x1329   :  { %v1886_v52 = vmul.f32 0.0078125, %v1883_v57 }
0x132a   :  { %v1885_v59 = vpop.xlane.xlu0 %1884 }
0x132b   :  { %v1888_v60 = vsub.f32 %v1876_v45, %v1886_v52  ;;  %v1887_v61 = vmul.f32 0.0078125, %v1885_v59  ;;  %v1948_v45 = vrot.slane %v2772_v43, %v3649_v58 }
0x132d   :  { %v1889_v62 = vsub.f32 %v1877_v46, %v1887_v61  ;;  %v1890_v50 = vmul.f32 %v1888_v60, %v1888_v60 }
0x132f   :  { %1892 = vadd.xlane.f32.xlu0 %v1890_v50  ;;  %v1891_v51 = vmul.f32 %v1889_v62, %v1889_v62 }
0x1331   :  { %1894 = vadd.xlane.f32.xlu1 %v1891_v51 }
0x13bc   :  { %v1893_v10 = vpop.xlane.xlu0 %1892 }
0x13bd   :  { %v1896_v21 = vmul.f32 0.0078125, %v1893_v10 }
0x13be   :  { %v1895_v11 = vpop.xlane.xlu1 %1894 }
0x13bf   :  { %v1898_v25 = vadd.f32 1e-12, %v1896_v21  ;;  %v1897_v54 = vmul.f32 0.0078125, %v1895_v11 }
0x13c1   :  { %3358 = vrsqrt.f32 %v1898_v25  ;;  %v1899_v56 = vadd.f32 1e-12, %v1897_v54 }
0x13c3   :  { %3360 = vrsqrt.f32 %v1899_v56 }
0x13cb   :  { %v3359_v14 = vpop.eup %3358 }
0x13cc   :  { %v1902_v16 = vmul.f32 %v3359_v14, %v1888_v60 }
0x13cd   :  { %v3361_v13 = vpop.eup %3360 }
0x13ce   :  { %v1903_v17 = vmul.f32 %v3361_v13, %v1889_v62  ;;  %v1910_v18 = vmul.f32 %v2754_v15, %v1902_v16 }
0x13d0   :  { %v1911_v19 = vmul.f32 %v2754_v15, %v1903_v17  ;;  %v3980_v30 = vadd.f32 %v2755_v12, %v1910_v18 }
0x13d2   :  { %v3982_v20 = vadd.f32 %v2755_v12, %v1911_v19 }
0x13d4   :  { %v1937_v22 = vpack.c.bf16 %v3982_v20, %v3980_v30 }
0x13d6   :  { %2064 = vmatmul.mubr.bf16.vlgmr.msra.gmra.mrb[40].mxu1 %v1937_v22 }
0x13d7   :  { %3076 = vmatprep.mubr.msk.bf16.mxu1 %vm3456_vm0, %v3454_v4 }
0x14a9   :  { %v2065_v46 = vpop.f32.mrb[40].mxu1 }
0x14aa   :  { %v2066_v47 = vadd.f32 %v2065_v46, %v1944_v44  ;;  %v2067_v48 = vpop.f32.mrb[41].mxu1 }
0x14ab   :  { %v2068_v49 = vadd.f32 %v2067_v48, %v1948_v45  ;;  %v2069_v53 = vpop.f32.mrb[42].mxu1 }
0x14ac   :  { %v2078_v57 = vmul.f32 0.044715, %v2066_v47  ;;  %v2070_v52 = vadd.f32 %v2069_v53, %v1944_v44  ;;  %v2071_v59 = vpop.f32.mrb[43].mxu1  ;;  %v2074_v15 = vmul.f32 0.5, %v2066_v47 }
0x14ad   :  { %v2079_v60 = vmul.f32 0.044715, %v2068_v49  ;;  %v2072_v61 = vadd.f32 %v2071_v59, %v1948_v45  ;;  %v2075_v17 = vmul.f32 0.5, %v2068_v49 }
0x14ae   :  { %v2082_v62 = vmul.f32 %v2078_v57, %v2066_v47  ;;  %v2080_v50 = vmul.f32 0.044715, %v2070_v52  ;;  %v2076_v16 = vmul.f32 0.5, %v2070_v52 }
0x14af   :  { %v2083_v51 = vmul.f32 %v2079_v60, %v2068_v49  ;;  %v2081_v63 = vmul.f32 0.044715, %v2072_v61  ;;  %v2077_v18 = vmul.f32 0.5, %v2072_v61 }
0x14b0   :  { %v2086_v0 = vmul.f32 %v2082_v62, %v2066_v47  ;;  %v2084_v1 = vmul.f32 %v2080_v50, %v2070_v52 }
0x14b1   :  { %v2087_v2 = vmul.f32 %v2083_v51, %v2068_v49  ;;  %v2085_v55 = vmul.f32 %v2081_v63, %v2072_v61 }
0x14b2   :  { %v2090_v3 = vadd.f32 %v2086_v0, %v2066_v47  ;;  %v2088_v58 = vmul.f32 %v2084_v1, %v2070_v52  ;;  %v2810_v0 = vld [vmem:[%s4110_s16 + $0x1] ss:$0 sm:$0xff] }
0x14b3   :  { %v2089_v5 = vmul.f32 %v2085_v55, %v2072_v61  ;;  %v2091_v6 = vadd.f32 %v2087_v2, %v2068_v49 }
0x14b4   :  { %v2094_v7 = vmul.f32 0.7978846, %v2090_v3  ;;  %v2092_v36 = vadd.f32 %v2088_v58, %v2070_v52  ;;  %v2334_v58 = vld [vmem:[%s4132_s6] sm:$0x1] }
0x14b5   :  { %v2093_v8 = vadd.f32 %v2089_v5, %v2072_v61  ;;  %v2095_v37 = vmul.f32 0.7978846, %v2091_v6  ;;  %v2809_v61 = vld [vmem:[%s4109_s15 + $0x1] ss:$0 sm:$0xff]  ;;  %v3291_v6 = vld [vmem:[%s4111_s17 + $0x8] sm:$0xff]  }
0x14b6   :  { %3362 = vtanh.f32 %v2094_v7  ;;  %v2096_v9 = vmul.f32 0.7978846, %v2092_v36  ;;  %v3290_v5 = vld [vmem:[%s4111_s17] sm:$0xff]   ;;  %v3292_v7 = vld [vmem:[%s4111_s17 + $0x10] sm:$0xff]   ;;  %v3293_v36 = vld [vmem:[%s4111_s17 + $0x18] sm:$0xff]  }
0x14b7   :  { %v2097_v10 = vmul.f32 0.7978846, %v2093_v8  ;;  %3364 = vtanh.f32 %v2095_v37  ;;  %v3294_v8 = vld [vmem:[%s4111_s17 + $0x20] sm:$0xff]   ;;  %v3295_v37 = vld [vmem:[%s4111_s17 + $0x28] sm:$0xff]  }
0x14b8   :  { %3366 = vtanh.f32 %v2096_v9  ;;  %v3296_v9 = vld [vmem:[%s4111_s17 + $0x30] sm:$0xff]  }
0x14b9   :  { %3368 = vtanh.f32 %v2097_v10  ;;  %v3297_v10 = vld [vmem:[%s4111_s17 + $0x38] sm:$0xff]  }
0x14c0   :  { %v3363_v21 = vpop.eup %3362 }
0x14c1   :  { %v3365_v11 = vpop.eup %3364  ;;  %v2102_v25 = vadd.f32 1.0, %v3363_v21  ;;  %v3298_v21 = vld [vmem:[%s4113_s19] sm:$0xff]  }
0x14c2   :  { %v3367_v54 = vpop.eup %3366  ;;  %v2103_v56 = vadd.f32 1.0, %v3365_v11  ;;  %v3299_v11 = vld [vmem:[%s4113_s19 + $0x8] sm:$0xff]  }
0x14c3   :  { %v3369_v14 = vpop.eup %3368  ;;  %v2104_v13 = vadd.f32 1.0, %v3367_v54  ;;  %v2106_v19 = vmul.f32 %v2102_v25, %v2074_v15  ;;  %v3300_v25 = vld [vmem:[%s4113_s19 + $0x10] sm:$0xff]   ;;  %v3301_v54 = vld [vmem:[%s4113_s19 + $0x18] sm:$0xff]  }
0x14c4   :  { %v2105_v12 = vadd.f32 1.0, %v3369_v14  ;;  %v2107_v23 = vmul.f32 %v2103_v56, %v2075_v17  ;;  %v3302_v17 = vld [vmem:[%s4113_s19 + $0x20] sm:$0xff]  }
0x14c5   :  { %v2108_v22 = vmul.f32 %v2104_v13, %v2076_v16 }
0x14c6   :  { %v2109_v24 = vmul.f32 %v2105_v12, %v2077_v18  ;;  %v3303_v18 = vld [vmem:[%s4113_s19 + $0x28] sm:$0xff]   ;;  %v3304_v12 = vld [vmem:[%s4113_s19 + $0x30] sm:$0xff]  }
0x14c7   :  { %v2143_v26 = vpack.c.bf16 %v2108_v22, %v2106_v19  ;;  %v3305_v19 = vld [vmem:[%s4113_s19 + $0x38] sm:$0xff]   ;;  %v2812_v22 = vld [vmem:[%s4112_s18] ss:$0 sm:$0xff]  ;;  %s2611_s19 = sshll.u32 %s3457_s28, 4  ;;  %s2612_s19 = int_to_ptr.vmem [resolvable:$true] %s2611_s19 }
0x14c8   :  { %v2144_v27 = vpack.c.bf16 %v2109_v24, %v2107_v23  ;;  %s3420_s18 = scalar_lea.vmem %s2612_s19, 32  ;;  %p3425_p3 = scmp.lt.s32.totalorder %s2612_s19, %s2612_s19 }
0x14c9   :  { %p3421_p2 = scmp.ne.s32.totalorder %s2612_s19, %s3420_s18  ;;  %p3426_p4 = scmp.lt.s32.totalorder %s3420_s18, %s3420_s18 }
0x14ca   :  { %2281 = vmatprep.mubr.bf16.mxu0 %v2144_v27 }
0x14cb   :  { %2282 = vmatmul.mubr.bf16.vlgmr.msra.gmra.mrb[24].mxu0 %v2143_v26  ;;  %p3427_p5 = por %p3426_p4, %p3425_p3 }
0x14cc   :  { %3116 = vmatprep.mubr.msk.bf16.mxu0 %vm3456_vm0, %v3454_v4  ;;  %3101 = vmatpush3.bf16.msra.mxu0 %v3298_v21 }
0x14cd   :  { %3102 = vmatprep.subr.bf16.mxu0 %v3454_v4  ;;  %p3428_p6 = pnand %p3427_p5, %p3421_p2 }
0x14d0   :  { %3103 = vmatpush3.bf16.msra.mxu0 %v3299_v11 }
0x14d1   :  { %3104 = vmatprep.subr.bf16.mxu0 %v3454_v4 }
0x14d4   :  { %3105 = vmatpush3.bf16.msra.mxu0 %v3300_v25 }
0x14d5   :  { %3106 = vmatprep.subr.bf16.mxu0 %v3454_v4 }
0x14d8   :  { %3107 = vmatpush3.bf16.msra.mxu0 %v3301_v54 }
0x14d9   :  { %3108 = vmatprep.subr.bf16.mxu0 %v3454_v4 }
0x14dc   :  { %3109 = vmatpush3.bf16.msra.mxu0 %v3302_v17 }
0x14dd   :  { %3110 = vmatprep.subr.bf16.mxu0 %v3454_v4 }
0x14e0   :  { %3111 = vmatpush3.bf16.msra.mxu0 %v3303_v18 }
0x14e1   :  { %3112 = vmatprep.subr.bf16.mxu0 %v3454_v4 }
0x14e4   :  { %3113 = vmatpush3.bf16.msra.mxu0 %v3304_v12 }
0x14e5   :  { %3114 = vmatprep.subr.bf16.mxu0 %v3454_v4 }
0x14e8   :  { %3115 = vmatpush3.bf16.msra.mxu0 %v3305_v19 }
0x159e   :  { %v2920_v28 = vpop.f32.mrb[24].mxu0 }
0x159f   :  { %v2921_v31 = vpop.f32.mrb[25].mxu0 }
0x15a0   :  { %v2922_v32 = vadd.f32 %v2921_v31, %v2920_v28  ;;  %v2923_v33 = vpop.f32.mrb[26].mxu0 }
0x15a1   :  { %v2924_v34 = vpop.f32.mrb[27].mxu0 }
0x15a2   :  { %v2284_v35 = vadd.f32 %v2922_v32, %v2790_v29  ;;  %v2925_v38 = vadd.f32 %v2924_v34, %v2923_v33 }
0x15a4   :  { %v2287_v39 = vadd.f32 %v2925_v38, %v2790_v29  ;;  %v2290_v40 = vadd.f32 %v2284_v35, %v3980_v30 }
0x15a6   :  { %2296 = vadd.xlane.f32.xlu0 %v2290_v40  ;;  %v2291_v41 = vadd.f32 %v2287_v39, %v3982_v20 }
0x15a8   :  { %2298 = vadd.xlane.f32.xlu1 %v2291_v41 }
0x1633   :  { %v2297_v42 = vpop.xlane.xlu0 %2296 }
0x1634   :  { %v2300_v43 = vmul.f32 0.0078125, %v2297_v42 }
0x1635   :  { %v2299_v44 = vpop.xlane.xlu1 %2298 }
0x1636   :  { %v2302_v45 = vsub.f32 %v2290_v40, %v2300_v43  ;;  %v2301_v46 = vmul.f32 0.0078125, %v2299_v44 }
0x1638   :  { %v2303_v47 = vsub.f32 %v2291_v41, %v2301_v46  ;;  %v2304_v48 = vmul.f32 %v2302_v45, %v2302_v45 }
0x163a   :  { %2306 = vadd.xlane.f32.xlu0 %v2304_v48  ;;  %v2305_v49 = vmul.f32 %v2303_v47, %v2303_v47 }
0x163c   :  { %2308 = vadd.xlane.f32.xlu1 %v2305_v49 }
0x16c7   :  { %v2307_v53 = vpop.xlane.xlu0 %2306 }
0x16c8   :  { %v2310_v57 = vmul.f32 0.0078125, %v2307_v53 }
0x16c9   :  { %v2309_v52 = vpop.xlane.xlu1 %2308 }
0x16ca   :  { %v2312_v59 = vadd.f32 1e-12, %v2310_v57  ;;  %v2311_v60 = vmul.f32 0.0078125, %v2309_v52 }
0x16cc   :  { %3370 = vrsqrt.f32 %v2312_v59  ;;  %v2313_v30 = vadd.f32 1e-12, %v2311_v60 }
0x16ce   :  { %3372 = vrsqrt.f32 %v2313_v30 }
0x16d6   :  { %v3371_v20 = vpop.eup %3370 }
0x16d7   :  { %v2316_v62 = vmul.f32 %v3371_v20, %v2302_v45 }
0x16d8   :  { %v3373_v50 = vpop.eup %3372 }
0x16d9   :  { %v2317_v51 = vmul.f32 %v3373_v50, %v2303_v47  ;;  %v2324_v63 = vmul.f32 %v2809_v61, %v2316_v62 }
0x16db   :  { %v2325_v1 = vmul.f32 %v2809_v61, %v2317_v51  ;;  %v2332_v2 = vadd.f32 %v2810_v0, %v2324_v63 }
0x16dd   :  { %v2333_v55 = vadd.f32 %v2810_v0, %v2325_v1 }
0x16df   :  { %v2335_v3 = vpack.c.bf16 %v2333_v55, %v2332_v2 }
0x16e1   :  { %3075 = vmatpush3.bf16.msra.mxu1 %v2335_v3 }
0x16e2   :  { %3080 = vmatprep.subr.bf16.mxu1 %v3454_v4 }
0x16e4   :  { %3077 = vmatmul.mubr.msk.bf16.vlgmr.msra.gmra.mrb[44].mxu1 %vm459_vm2, %v2334_v58 }
0x16e5   :  { %3081 = vmatpush3.bf16.msra.mxu1 %v3290_v5  ;;  %3096 = vmatprep.mubr.msk.bf16.mxu1 %vm3456_vm0, %v3454_v4 }
0x16e6   :  { %3082 = vmatprep.subr.bf16.mxu1 %v3454_v4 }
0x16e9   :  { %3083 = vmatpush3.bf16.msra.mxu1 %v3291_v6 }
0x16ea   :  { %3084 = vmatprep.subr.bf16.mxu1 %v3454_v4 }
0x16ed   :  { %3085 = vmatpush3.bf16.msra.mxu1 %v3292_v7 }
0x16ee   :  { %3086 = vmatprep.subr.bf16.mxu1 %v3454_v4 }
0x16f1   :  { %3087 = vmatpush3.bf16.msra.mxu1 %v3293_v36 }
0x16f2   :  { %3088 = vmatprep.subr.bf16.mxu1 %v3454_v4 }
0x16f5   :  { %3089 = vmatpush3.bf16.msra.mxu1 %v3294_v8 }
0x16f6   :  { %3090 = vmatprep.subr.bf16.mxu1 %v3454_v4 }
0x16f9   :  { %3091 = vmatpush3.bf16.msra.mxu1 %v3295_v37 }
0x16fa   :  { %3092 = vmatprep.subr.bf16.mxu1 %v3454_v4 }
0x16fd   :  { %3093 = vmatpush3.bf16.msra.mxu1 %v3296_v9 }
0x16fe   :  { %3094 = vmatprep.subr.bf16.mxu1 %v3454_v4  ;;  %v2821_v4 = vld [vmem:[%s4114_s20] ss:$0 sm:$0xff] }
0x1701   :  { %3095 = vmatpush3.bf16.msra.mxu1 %v3297_v10 }
0x17b7   :  { %v2373_v56 = vpop.f32.mrb[44].mxu1 }
0x17b8   :  { %v2395_v14 = vpack.c.bf16 %v2373_v56, %v2373_v56  ;;  %v3078_v15 = vpop.f32.mrb[45].mxu1 }
0x17b9   :  { %v2376_v16 = vpop.f32.mrb[46].mxu1 }
0x17ba   :  { %v3079_v13 = vpop.f32.mrb[47].mxu1  ;;  %3097 = vmatmul.mubr.bf16.vlgmr.msra.gmra.mrb[48].mxu1 %v2395_v14 }
0x188d   :  { %v2485_v23 = vpop.f32.mrb[48].mxu1 }
0x188e   :  { %v2486_v24 = vadd.f32 %v2812_v22, %v2485_v23  ;;  %v3098_v26 = vpop.f32.mrb[49].mxu1 }
0x188f   :  { %v2488_v27 = vpop.f32.mrb[50].mxu1 }
0x1890   :  { %3374 = vtanh.f32 %v2486_v24  ;;  %v3099_v28 = vpop.f32.mrb[51].mxu1 }
0x189a   :  { %v3375_v29 = vpop.eup %3374 }
0x189b   :  { %v2508_v31 = vpack.c.bf16 %v3375_v29, %v3375_v29 }
0x189d   :  { %3117 = vmatmul.mubr.bf16.vlgmr.msra.gmra.mrb[28].mxu0 %v2508_v31 }
0x1970   :  { %v2598_v32 = vpop.f32.mrb[28].mxu0 }
0x1971   :  { %v2599_v33 = vadd.f32 %v2821_v4, %v2598_v32  ;;  %v3118_v34 = vpop.f32.mrb[29].mxu0 }
0x1972   :  { %v2601_v35 = vpop.f32.mrb[30].mxu0 }
0x1973   :  { %2604 = vst [vmem:[#allocation8] sm:$0x3] %v2599_v33  ;;  %v3119_v38 = vpop.f32.mrb[31].mxu0 }
0x1974   :  { %3431 = shalt.err (!%p3428_p6)
}
0x1975   :  { %s4133_s4 = sld [smem:[#allocation18_spill]] }
0x197b   :  { %s3432_s20 = scalar_lea.hbm %s4133_s4, 32 }
0x197c   :  { %p3433_p7 = scmp.ne.s32.totalorder %s4133_s4, %s3432_s20  ;;  %p3436_p8 = scmp.lt.u32.totalorder %s3432_s20, %s4133_s4 }
0x197e   :  { %p3438_p9 = pnand %p3436_p8, %p3433_p7 }
0x1980   :  { %3441 = shalt.err (!%p3438_p9)
}
0x1981   :  { %2614 = dma.vmem_to_hbm [thread:$0]  %s2612_s19, 32, %s4133_s4, [#allocation5]  }
0x1982   :  { %3446 = dma.done.wait [#allocation5], 32  }
0x1983   :  { %3447 = vsyncadd [#allocation5], 4294967264 }
0x1984   :  { %2618 = vsyncpa [#allocation4], 1 }
0x1985   :  { %2619 = vsyncpa [#allocation7], 1 }
0x1986   :  { %2620 = vsyncpa [#allocation5], 1 }

</bundles_post_ra>
